<compile_context>
chip_gen: v7x
topology: tpu7x:2x2x1
jax: 0.10.0
libtpu: 0.0.40
codegen_flags: <defaults>
</compile_context>

<pallas_src>
import numpy as np
import jax
import jax.numpy as jnp
from jax import lax
from jax.experimental import pallas as pl
from jax.experimental.pallas import tpu as pltpu

H = W = 7
HW = H * W                 # 49 real pixels
HW_PAD = 64                # padded rows: multiple of 8 (f32) and 16 (bf16) sublanes
C_IN, C_MID, C_OUT = 512, 128, 32
N_TAPS = 9
EPS = 1e-5


def fused_kernel(x_ref, w1_ref, w2p_ref, gamma_ref, beta_ref, mask_ref, out_ref):
    # x_ref:    (64, 512)  f32   NHWC-flattened input, rows >= 49 are zero
    # w1_ref:   (512, 128) bf16  1x1 conv weight (in x out)
    # w2p_ref:  (128, 288) bf16  3x3 conv weight, taps packed along N: col = tap*32 + o
    # gamma/beta: (1, 128) f32
    # mask_ref: (64, 288)  f32   per-(source pixel, tap) validity (0/1)
    # out_ref:  (64, 32)   f32

    # relu88 + conv2d88 (1x1 conv == single channel matmul on the MXU)
    x = jnp.maximum(x_ref[...], 0.0).astype(jnp.bfloat16)
    y = jnp.dot(x, w1_ref[...], preferred_element_type=jnp.float32)      # (64,128) f32

    # batchnorm2d89 (training-mode batch stats, biased variance) + relu89.
    # Padded rows of y are exactly zero, so sums over 64 rows == sums over 49.
    inv_n = 1.0 / HW
    s1 = jnp.sum(y, axis=0, keepdims=True)
    s2 = jnp.sum(y * y, axis=0, keepdims=True)
    mean = s1 * inv_n
    var = s2 * inv_n - mean * mean
    scale = gamma_ref[...] * lax.rsqrt(var + EPS)                        # (1,128)
    shift = beta_ref[...] - mean * scale
    ya = jnp.maximum(y * scale + shift, 0.0).astype(jnp.bfloat16)        # (64,128)

    # conv2d89: one lane-dense matmul against all 9 packed taps, then zero out
    # contributions from invalid / out-of-image source pixels.
    y9 = jnp.dot(ya, w2p_ref[...], preferred_element_type=jnp.float32)   # (64,288)
    y9 = y9 * mask_ref[...]

    # Finish: out[p] = sum_taps y9[p + shift_tap, tap]; all shifts are static.
    out_ref[...] = y9[:, 4 * C_OUT:5 * C_OUT]            # center tap (shift 0)
    for ky in range(3):
        for kx in range(3):
            if ky == 1 and kx == 1:
                continue
            t = ky * 3 + kx
            s = (ky - 1) * W + (kx - 1)                  # flat row shift in [-8, 8]
            dst0 = max(0, -s)
            src0 = max(0, s)
            n = HW_PAD - abs(s)
            tap = y9[:, t * C_OUT:(t + 1) * C_OUT]       # (64, 32)
            out_ref[pl.ds(dst0, n), :] = (out_ref[pl.ds(dst0, n), :]
                                          + tap[src0:src0 + n, :])


def _tap_mask():
    # mask[p, tap*32 + o] = 1 iff source pixel p (flat r*W + c, p < 49) may
    # contribute through tap (ky,kx): the receiving output column c - dx must
    # lie inside the image.  Row validity is handled by the shifted-add ranges
    # plus the zeroed padded rows; column wrap-around is handled here.
    m = np.zeros((HW_PAD, N_TAPS * C_OUT), np.float32)
    for p in range(HW):
        c = p % W
        for ky in range(3):
            for kx in range(3):
                dx = kx - 1
                valid = not ((dx == 1 and c == 0) or (dx == -1 and c == W - 1))
                if valid:
                    t = ky * 3 + kx
                    m[p, t * C_OUT:(t + 1) * C_OUT] = 1.0
    return m


def run_module(x_nchw, w1_oihw, w2_oihw, gamma, beta):
    assert x_nchw.shape == (1, C_IN, H, W)
    x2d = jnp.transpose(x_nchw, (0, 2, 3, 1)).reshape(HW, C_IN)
    x2d = jnp.pad(x2d, ((0, HW_PAD - HW), (0, 0)))                       # (64, 512)

    w1 = w1_oihw.reshape(C_MID, C_IN).T.astype(jnp.bfloat16)             # (512, 128)
    w2p = jnp.transpose(w2_oihw, (1, 2, 3, 0)).reshape(
        C_MID, N_TAPS * C_OUT).astype(jnp.bfloat16)                      # (128, 288)
    g = gamma.reshape(1, C_MID).astype(jnp.float32)
    b = beta.reshape(1, C_MID).astype(jnp.float32)
    mask = jnp.asarray(_tap_mask())                                      # (64, 288)

    out2d = pl.pallas_call(
        fused_kernel,
        out_shape=jax.ShapeDtypeStruct((HW_PAD, C_OUT), jnp.float32),
        in_specs=[pl.BlockSpec(memory_space=pltpu.MemorySpace.VMEM)] * 6,
        out_specs=pl.BlockSpec(memory_space=pltpu.MemorySpace.VMEM),
        cost_estimate=pl.CostEstimate(
            flops=2 * HW_PAD * C_MID * (C_IN + N_TAPS * C_OUT),
            transcendentals=C_MID,
            bytes_accessed=4 * HW_PAD * (C_IN + N_TAPS * C_OUT + C_OUT)
                           + 2 * C_MID * (C_IN + N_TAPS * C_OUT)),
    )(x2d, w1, w2p, g, b, mask)

    out = out2d[:HW].reshape(1, H, W, C_OUT)
    return jnp.transpose(out, (0, 3, 1, 2))                              # (1, 32, 7, 7)


def reference(x, w1_oihw, w2_oihw, gamma, beta):
    x316 = jnp.maximum(x, 0.0)
    x317 = lax.conv_general_dilated(x316, w1_oihw, (1, 1), 'VALID',
                                    dimension_numbers=('NCHW', 'OIHW', 'NCHW'),
                                    precision=lax.Precision.HIGHEST)
    mean = jnp.mean(x317, axis=(0, 2, 3), keepdims=True)
    var = jnp.mean((x317 - mean) ** 2, axis=(0, 2, 3), keepdims=True)
    x318 = (x317 - mean) * lax.rsqrt(var + EPS) * gamma.reshape(1, -1, 1, 1) \
           + beta.reshape(1, -1, 1, 1)
    x319 = jnp.maximum(x318, 0.0)
    x320 = lax.conv_general_dilated(x319, w2_oihw, (1, 1), ((1, 1), (1, 1)),
                                    dimension_numbers=('NCHW', 'OIHW', 'NCHW'),
                                    precision=lax.Precision.HIGHEST)
    return x320


if __name__ == "__main__":
    key = jax.random.PRNGKey(0)
    k1, k2, k3, k4, k5 = jax.random.split(key, 5)

    x = jax.random.normal(k1, (1, C_IN, H, W), jnp.float32)
    w1 = jax.random.normal(k2, (C_MID, C_IN, 1, 1), jnp.float32) * 0.05   # conv2d88 weight
    w2 = jax.random.normal(k3, (C_OUT, C_MID, 3, 3), jnp.float32) * 0.05  # conv2d89 weight
    gamma = 1.0 + 0.1 * jax.random.normal(k4, (C_MID,), jnp.float32)      # BN weight
    beta = 0.1 * jax.random.normal(k5, (C_MID,), jnp.float32)             # BN bias

    out = run_module(x, w1, w2, gamma, beta)
    jax.block_until_ready(out)
    assert out.shape == (1, C_OUT, H, W)

    ref = reference(x, w1, w2, gamma, beta)
    np.testing.assert_allclose(np.asarray(out), np.asarray(ref), rtol=3e-2, atol=3e-2)

    print("KERNEL_OK")
</pallas_src>

<mosaic_0001>
module attributes {stable_mosaic.version = 11 : i64} {
  func.func @fused_kernel(%arg0: memref<64x512xf32, #tpu.memory_space<vmem>>, %arg1: memref<512x128xbf16, #tpu.memory_space<vmem>>, %arg2: memref<128x288xbf16, #tpu.memory_space<vmem>>, %arg3: memref<1x128xf32, #tpu.memory_space<vmem>>, %arg4: memref<1x128xf32, #tpu.memory_space<vmem>>, %arg5: memref<64x288xf32, #tpu.memory_space<vmem>>, %arg6: memref<64x32xf32, #tpu.memory_space<vmem>>) attributes {dimension_semantics = [], scalar_prefetch = 0 : i64, scratch_operands = 0 : i64, tpu.core_type = #tpu.core_type<tc>} {
    %c0 = arith.constant 0 : index
    %c0_0 = arith.constant 0 : index
    %0 = vector.load %arg0[%c0, %c0_0] : memref<64x512xf32, #tpu.memory_space<vmem>>, vector<64x512xf32>
    %cst = arith.constant 0.000000e+00 : f32
    %1 = vector.broadcast %cst : f32 to vector<64x512xf32>
    %2 = arith.maximumf %0, %1 : vector<64x512xf32>
    %3 = arith.truncf %2 : vector<64x512xf32> to vector<64x512xbf16>
    %c0_1 = arith.constant 0 : index
    %c0_2 = arith.constant 0 : index
    %4 = vector.load %arg1[%c0_1, %c0_2] : memref<512x128xbf16, #tpu.memory_space<vmem>>, vector<512x128xbf16>
    %cst_3 = arith.constant dense<0.000000e+00> : vector<64x128xf32>
    %5 = tpu.matmul %3, %4, %cst_3 {dimension_numbers = #tpu.dot_dimension_numbers<[1], [0], [0], [1], [0, 0, 1, 1], [], []>} : vector<64x512xbf16>, vector<512x128xbf16>, vector<64x128xf32> -> vector<64x128xf32>
    %cst_4 = arith.constant dense<0.000000e+00> : vector<128xf32>
    %6 = vector.multi_reduction <add>, %5, %cst_4 [0] : vector<64x128xf32> to vector<128xf32>
    %7 = vector.shape_cast %6 : vector<128xf32> to vector<1x128xf32>
    %8 = arith.mulf %5, %5 : vector<64x128xf32>
    %cst_5 = arith.constant dense<0.000000e+00> : vector<128xf32>
    %9 = vector.multi_reduction <add>, %8, %cst_5 [0] : vector<64x128xf32> to vector<128xf32>
    %10 = vector.shape_cast %9 : vector<128xf32> to vector<1x128xf32>
    %cst_6 = arith.constant 0.0204081628 : f32
    %11 = vector.broadcast %cst_6 : f32 to vector<1x128xf32>
    %12 = arith.mulf %7, %11 : vector<1x128xf32>
    %cst_7 = arith.constant 0.0204081628 : f32
    %13 = vector.broadcast %cst_7 : f32 to vector<1x128xf32>
    %14 = arith.mulf %10, %13 : vector<1x128xf32>
    %15 = arith.mulf %12, %12 : vector<1x128xf32>
    %16 = arith.subf %14, %15 : vector<1x128xf32>
    %c0_8 = arith.constant 0 : index
    %c0_9 = arith.constant 0 : index
    %17 = vector.load %arg3[%c0_8, %c0_9] : memref<1x128xf32, #tpu.memory_space<vmem>>, vector<1x128xf32>
    %cst_10 = arith.constant 9.99999974E-6 : f32
    %18 = vector.broadcast %cst_10 : f32 to vector<1x128xf32>
    %19 = arith.addf %16, %18 : vector<1x128xf32>
    %20 = math.rsqrt %19 : vector<1x128xf32>
    %21 = arith.mulf %17, %20 : vector<1x128xf32>
    %c0_11 = arith.constant 0 : index
    %c0_12 = arith.constant 0 : index
    %22 = vector.load %arg4[%c0_11, %c0_12] : memref<1x128xf32, #tpu.memory_space<vmem>>, vector<1x128xf32>
    %23 = arith.mulf %12, %21 : vector<1x128xf32>
    %24 = arith.subf %22, %23 : vector<1x128xf32>
    %25 = vector.broadcast %21 : vector<1x128xf32> to vector<64x128xf32>
    %26 = arith.mulf %5, %25 : vector<64x128xf32>
    %27 = vector.broadcast %24 : vector<1x128xf32> to vector<64x128xf32>
    %28 = arith.addf %26, %27 : vector<64x128xf32>
    %cst_13 = arith.constant 0.000000e+00 : f32
    %29 = vector.broadcast %cst_13 : f32 to vector<64x128xf32>
    %30 = arith.maximumf %28, %29 : vector<64x128xf32>
    %31 = arith.truncf %30 : vector<64x128xf32> to vector<64x128xbf16>
    %c0_14 = arith.constant 0 : index
    %c0_15 = arith.constant 0 : index
    %32 = vector.load %arg2[%c0_14, %c0_15] : memref<128x288xbf16, #tpu.memory_space<vmem>>, vector<128x288xbf16>
    %cst_16 = arith.constant dense<0.000000e+00> : vector<64x288xf32>
    %33 = tpu.matmul %31, %32, %cst_16 {dimension_numbers = #tpu.dot_dimension_numbers<[1], [0], [0], [1], [0, 0, 1, 1], [], []>} : vector<64x128xbf16>, vector<128x288xbf16>, vector<64x288xf32> -> vector<64x288xf32>
    %c0_17 = arith.constant 0 : index
    %c0_18 = arith.constant 0 : index
    %34 = vector.load %arg5[%c0_17, %c0_18] : memref<64x288xf32, #tpu.memory_space<vmem>>, vector<64x288xf32>
    %35 = arith.mulf %33, %34 : vector<64x288xf32>
    %36 = vector.extract_strided_slice %35 {offsets = [0, 128], sizes = [64, 32], strides = [1, 1]} : vector<64x288xf32> to vector<64x32xf32>
    %c0_19 = arith.constant 0 : index
    %c0_20 = arith.constant 0 : index
    %37 = vector.load %arg6[%c0_19, %c0_20] : memref<64x32xf32, #tpu.memory_space<vmem>>, vector<64x32xf32>
    tpu.vector_store %arg6[%c0_19, %c0_20], %36 {strides = array<i32>} : memref<64x32xf32, #tpu.memory_space<vmem>>, vector<64x32xf32>,
    %38 = vector.extract_strided_slice %35 {offsets = [0, 0], sizes = [64, 32], strides = [1, 1]} : vector<64x288xf32> to vector<64x32xf32>
    %c8 = arith.constant 8 : index
    %c0_21 = arith.constant 0 : index
    %39 = vector.load %arg6[%c8, %c0_21] : memref<64x32xf32, #tpu.memory_space<vmem>>, vector<56x32xf32>
    %40 = vector.extract_strided_slice %38 {offsets = [0, 0], sizes = [56, 32], strides = [1, 1]} : vector<64x32xf32> to vector<56x32xf32>
    %41 = arith.addf %39, %40 : vector<56x32xf32>
    %c8_22 = arith.constant 8 : index
    %c0_23 = arith.constant 0 : index
    %42 = vector.load %arg6[%c8_22, %c0_23] : memref<64x32xf32, #tpu.memory_space<vmem>>, vector<56x32xf32>
    tpu.vector_store %arg6[%c8_22, %c0_23], %41 {strides = array<i32>} : memref<64x32xf32, #tpu.memory_space<vmem>>, vector<56x32xf32>,
    %43 = vector.extract_strided_slice %35 {offsets = [0, 32], sizes = [64, 32], strides = [1, 1]} : vector<64x288xf32> to vector<64x32xf32>
    %c7 = arith.constant 7 : index
    %c0_24 = arith.constant 0 : index
    %44 = vector.load %arg6[%c7, %c0_24] : memref<64x32xf32, #tpu.memory_space<vmem>>, vector<57x32xf32>
    %45 = vector.extract_strided_slice %43 {offsets = [0, 0], sizes = [57, 32], strides = [1, 1]} : vector<64x32xf32> to vector<57x32xf32>
    %46 = arith.addf %44, %45 : vector<57x32xf32>
    %c7_25 = arith.constant 7 : index
    %c0_26 = arith.constant 0 : index
    %47 = vector.load %arg6[%c7_25, %c0_26] : memref<64x32xf32, #tpu.memory_space<vmem>>, vector<57x32xf32>
    tpu.vector_store %arg6[%c7_25, %c0_26], %46 {strides = array<i32>} : memref<64x32xf32, #tpu.memory_space<vmem>>, vector<57x32xf32>,
    %48 = vector.extract_strided_slice %35 {offsets = [0, 64], sizes = [64, 32], strides = [1, 1]} : vector<64x288xf32> to vector<64x32xf32>
    %c6 = arith.constant 6 : index
    %c0_27 = arith.constant 0 : index
    %49 = vector.load %arg6[%c6, %c0_27] : memref<64x32xf32, #tpu.memory_space<vmem>>, vector<58x32xf32>
    %50 = vector.extract_strided_slice %48 {offsets = [0, 0], sizes = [58, 32], strides = [1, 1]} : vector<64x32xf32> to vector<58x32xf32>
    %51 = arith.addf %49, %50 : vector<58x32xf32>
    %c6_28 = arith.constant 6 : index
    %c0_29 = arith.constant 0 : index
    %52 = vector.load %arg6[%c6_28, %c0_29] : memref<64x32xf32, #tpu.memory_space<vmem>>, vector<58x32xf32>
    tpu.vector_store %arg6[%c6_28, %c0_29], %51 {strides = array<i32>} : memref<64x32xf32, #tpu.memory_space<vmem>>, vector<58x32xf32>,
    %53 = vector.extract_strided_slice %35 {offsets = [0, 96], sizes = [64, 32], strides = [1, 1]} : vector<64x288xf32> to vector<64x32xf32>
    %c1 = arith.constant 1 : index
    %c0_30 = arith.constant 0 : index
    %54 = vector.load %arg6[%c1, %c0_30] : memref<64x32xf32, #tpu.memory_space<vmem>>, vector<63x32xf32>
    %55 = vector.extract_strided_slice %53 {offsets = [0, 0], sizes = [63, 32], strides = [1, 1]} : vector<64x32xf32> to vector<63x32xf32>
    %56 = arith.addf %54, %55 : vector<63x32xf32>
    %c1_31 = arith.constant 1 : index
    %c0_32 = arith.constant 0 : index
    %57 = vector.load %arg6[%c1_31, %c0_32] : memref<64x32xf32, #tpu.memory_space<vmem>>, vector<63x32xf32>
    tpu.vector_store %arg6[%c1_31, %c0_32], %56 {strides = array<i32>} : memref<64x32xf32, #tpu.memory_space<vmem>>, vector<63x32xf32>,
    %58 = vector.extract_strided_slice %35 {offsets = [0, 160], sizes = [64, 32], strides = [1, 1]} : vector<64x288xf32> to vector<64x32xf32>
    %c0_33 = arith.constant 0 : index
    %c0_34 = arith.constant 0 : index
    %59 = vector.load %arg6[%c0_33, %c0_34] : memref<64x32xf32, #tpu.memory_space<vmem>>, vector<63x32xf32>
    %60 = vector.extract_strided_slice %58 {offsets = [1, 0], sizes = [63, 32], strides = [1, 1]} : vector<64x32xf32> to vector<63x32xf32>
    %61 = arith.addf %59, %60 : vector<63x32xf32>
    %c0_35 = arith.constant 0 : index
    %c0_36 = arith.constant 0 : index
    %62 = vector.load %arg6[%c0_35, %c0_36] : memref<64x32xf32, #tpu.memory_space<vmem>>, vector<63x32xf32>
    tpu.vector_store %arg6[%c0_35, %c0_36], %61 {strides = array<i32>} : memref<64x32xf32, #tpu.memory_space<vmem>>, vector<63x32xf32>,
    %63 = vector.extract_strided_slice %35 {offsets = [0, 192], sizes = [64, 32], strides = [1, 1]} : vector<64x288xf32> to vector<64x32xf32>
    %c0_37 = arith.constant 0 : index
    %c0_38 = arith.constant 0 : index
    %64 = vector.load %arg6[%c0_37, %c0_38] : memref<64x32xf32, #tpu.memory_space<vmem>>, vector<58x32xf32>
    %65 = vector.extract_strided_slice %63 {offsets = [6, 0], sizes = [58, 32], strides = [1, 1]} : vector<64x32xf32> to vector<58x32xf32>
    %66 = arith.addf %64, %65 : vector<58x32xf32>
    %c0_39 = arith.constant 0 : index
    %c0_40 = arith.constant 0 : index
    %67 = vector.load %arg6[%c0_39, %c0_40] : memref<64x32xf32, #tpu.memory_space<vmem>>, vector<58x32xf32>
    tpu.vector_store %arg6[%c0_39, %c0_40], %66 {strides = array<i32>} : memref<64x32xf32, #tpu.memory_space<vmem>>, vector<58x32xf32>,
    %68 = vector.extract_strided_slice %35 {offsets = [0, 224], sizes = [64, 32], strides = [1, 1]} : vector<64x288xf32> to vector<64x32xf32>
    %c0_41 = arith.constant 0 : index
    %c0_42 = arith.constant 0 : index
    %69 = vector.load %arg6[%c0_41, %c0_42] : memref<64x32xf32, #tpu.memory_space<vmem>>, vector<57x32xf32>
    %70 = vector.extract_strided_slice %68 {offsets = [7, 0], sizes = [57, 32], strides = [1, 1]} : vector<64x32xf32> to vector<57x32xf32>
    %71 = arith.addf %69, %70 : vector<57x32xf32>
    %c0_43 = arith.constant 0 : index
    %c0_44 = arith.constant 0 : index
    %72 = vector.load %arg6[%c0_43, %c0_44] : memref<64x32xf32, #tpu.memory_space<vmem>>, vector<57x32xf32>
    tpu.vector_store %arg6[%c0_43, %c0_44], %71 {strides = array<i32>} : memref<64x32xf32, #tpu.memory_space<vmem>>, vector<57x32xf32>,
    %73 = vector.extract_strided_slice %35 {offsets = [0, 256], sizes = [64, 32], strides = [1, 1]} : vector<64x288xf32> to vector<64x32xf32>
    %c0_45 = arith.constant 0 : index
    %c0_46 = arith.constant 0 : index
    %74 = vector.load %arg6[%c0_45, %c0_46] : memref<64x32xf32, #tpu.memory_space<vmem>>, vector<56x32xf32>
    %75 = vector.extract_strided_slice %73 {offsets = [8, 0], sizes = [56, 32], strides = [1, 1]} : vector<64x32xf32> to vector<56x32xf32>
    %76 = arith.addf %74, %75 : vector<56x32xf32>
    %c0_47 = arith.constant 0 : index
    %c0_48 = arith.constant 0 : index
    %77 = vector.load %arg6[%c0_47, %c0_48] : memref<64x32xf32, #tpu.memory_space<vmem>>, vector<56x32xf32>
    tpu.vector_store %arg6[%c0_47, %c0_48], %76 {strides = array<i32>} : memref<64x32xf32, #tpu.memory_space<vmem>>, vector<56x32xf32>,
    return
  }
}

</mosaic_0001>

<bundles_post_ra>
// kernel: tpu_custom_call.1
= control target key start
LH: loop header
LB: loop body
LE: loop exit
PB: predicated region body
PF: predicated region fallthrough
CT: control target
= control target key end

     0   :  { %11 = vsyncpa [#allocation3], 0  ;;  %s2529_s0 = inlined_call_operand.vmem [shape: f32[64,512], index: 0, kind: input, shape index: {}]   ;;  %s2530_s1 = inlined_call_operand.hbm [shape: bf16[512,128], index: 1, kind: input, shape index: {}]   ;;  %s2531_s2 = inlined_call_operand.vmem [shape: bf16[128,288], index: 2, kind: input, shape index: {}]   ;;  %s2532_s3 = inlined_call_operand.vmem [shape: f32[1,128], index: 3, kind: input, shape index: {}]   ;;  %s2533_s4 = inlined_call_operand.vmem [shape: f32[1,128], index: 4, kind: input, shape index: {}]   ;;  %s2534_s5 = inlined_call_operand.hbm [shape: f32[64,288], index: 5, kind: input, shape index: {}]   ;;  %s2535_s6 = inlined_call_operand.vmem [shape: f32[64,32], index: 6, kind: output, shape index: {}]  }
   0x1   :  { %12 = vsyncpa [#allocation5], 0  ;;  %s1653_s21 = smov [#allocation2]   ;;  %s1605_s25 = scalar_lea.hbm %s2530_s1, 4096 }
   0x2   :  { %s20_s22 = sshll.u32 %s1653_s21, 4  ;;  %p1606_p0 = scmp.ne.s32.totalorder %s2530_s1, %s1605_s25  ;;  %s21_s22 = int_to_ptr.vmem [resolvable:$true] %s20_s22 }
   0x3   :  { %p1609_p1 = scmp.lt.u32.totalorder %s1605_s25, %s2530_s1 }
   0x5   :  { %p1611_p2 = pnand %p1609_p1, %p1606_p0 }
   0x7   :  { %1614 = shalt.err (!%p1611_p2)
}
   0x8   :  { %s1615_s30 = scalar_lea.vmem %s21_s22, 4096  ;;  %p1620_p4 = scmp.lt.s32.totalorder %s21_s22, %s21_s22 }
   0x9   :  { %p1616_p3 = scmp.ne.s32.totalorder %s21_s22, %s1615_s30  ;;  %p1621_p5 = scmp.lt.s32.totalorder %s1615_s30, %s1615_s30 }
   0xb   :  { %p1622_p6 = por %p1621_p5, %p1620_p4 }
   0xd   :  { %p1623_p7 = pnand %p1622_p6, %p1616_p3 }
   0xf   :  { %1626 = shalt.err (!%p1623_p7)
}
  0x10   :  { %s1654_s7 = smov 64   ;;  %s1655_s8 = smov 4  }
  0x11   :  { %26 = dma.hbm_to_vmem [thread:$0]  %s2530_s1, 4096, %s21_s22, [#allocation3], %s1654_s7, %s1654_s7, %s1655_s8  }
  0x12   :  { %s1656_s11 = smov [#allocation4]   ;;  %s1627_s15 = scalar_lea.hbm %s2534_s5, 3072 }
  0x13   :  { %s38_s12 = sshll.u32 %s1656_s11, 4  ;;  %p1628_p8 = scmp.ne.s32.totalorder %s2534_s5, %s1627_s15  ;;  %s39_s12 = int_to_ptr.vmem [resolvable:$true] %s38_s12 }
  0x14   :  { %p1631_p9 = scmp.lt.u32.totalorder %s1627_s15, %s2534_s5 }
  0x16   :  { %p1633_p10 = pnand %p1631_p9, %p1628_p8 }
  0x18   :  { %1636 = shalt.err (!%p1633_p10)
}
  0x19   :  { %s1637_s20 = scalar_lea.vmem %s39_s12, 3072  ;;  %p1642_p12 = scmp.lt.s32.totalorder %s39_s12, %s39_s12 }
  0x1a   :  { %p1638_p11 = scmp.ne.s32.totalorder %s39_s12, %s1637_s20  ;;  %p1643_p13 = scmp.lt.s32.totalorder %s1637_s20, %s1637_s20 }
  0x1c   :  { %p1644_p0 = por %p1643_p13, %p1642_p12 }
  0x1e   :  { %p1645_p1 = pnand %p1644_p0, %p1638_p11 }
  0x20   :  { %1648 = shalt.err (!%p1645_p1)
}
  0x21   :  { %s1657_s1 = smov 384   ;;  %s1658_s21 = smov 24  }
  0x22   :  { %44 = dma.hbm_to_vmem [thread:$0]  %s2534_s5, 3072, %s39_s12, [#allocation5], %s1657_s1, %s1657_s1, %s1658_s21  }
  0x23   :  { %1649 = dma.done.wait [#allocation3], 4096  }
  0x24   :  { %1650 = vsyncadd [#allocation3], 4294963200 }
  0x25   :  { %1651 = dma.done.wait [#allocation5], 3072  }
  0x26   :  { %1652 = vsyncadd [#allocation5], 4294964224  ;;  %v1539_v0 = vld [vmem:[#allocation2 + $0x40] sm:$0xff]   ;;  %v1543_v4 = vld [vmem:[#allocation2 + $0x48] sm:$0xff]   ;;  %vm946_vm0 = vcmask 261120   ;;  %vm1147_vm1 = vcmask 1046528  }
  0x27   :  { %v1540_v1 = vld [vmem:[#allocation2 + $0xc0] sm:$0xff]   ;;  %1414 = vmatprep.subr.bf16.mxu0 %v1539_v0  ;;  %v1544_v5 = vld [vmem:[#allocation2 + $0xc8] sm:$0xff]   ;;  %v1547_v8 = vld [vmem:[#allocation2 + $0x50] sm:$0xff]   ;;  %vm1211_vm2 = vcmask 1041408   ;;  %vm1275_vm3 = vcmask 1040384   ;;  %vm1031_vm4 = vcmask 253952  }
  0x28   :  { %v1541_v2 = vld [vmem:[#allocation2] sm:$0xff]   ;;  %1454 = vmatprep.subr.bf16.mxu1 %v1540_v1  ;;  %v1545_v6 = vld [vmem:[#allocation2 + $0x8] sm:$0xff]   ;;  %v1548_v9 = vld [vmem:[#allocation2 + $0xd0] sm:$0xff]   ;;  %vm1080_vm5 = vcmask 254976   ;;  %vm1129_vm6 = vcmask 260096  }
  0x29   :  { %v1542_v3 = vld [vmem:[#allocation2 + $0x80] sm:$0xff]   ;;  %1415 = vmatpush3.bf16.msra.mxu0 %v1541_v2  ;;  %v1546_v7 = vld [vmem:[#allocation2 + $0x88] sm:$0xff]   ;;  %v1549_v10 = vld [vmem:[#allocation2 + $0x10] sm:$0xff]  }
  0x2a   :  { %1455 = vmatpush3.bf16.msra.mxu1 %v1542_v3  ;;  %1416 = vmatprep.subr.bf16.mxu0 %v1543_v4  ;;  %v1550_v11 = vld [vmem:[#allocation2 + $0x90] sm:$0xff]   ;;  %v1551_v12 = vld [vmem:[#allocation2 + $0x58] sm:$0xff]   ;;  %v1555_v16 = vld [vmem:[#allocation2 + $0x60] sm:$0xff]  }
  0x2b   :  { %1456 = vmatprep.subr.bf16.mxu1 %v1544_v5  ;;  %v1552_v13 = vld [vmem:[#allocation2 + $0xd8] sm:$0xff]   ;;  %v1556_v17 = vld [vmem:[#allocation2 + $0xe0] sm:$0xff]   ;;  %v1559_v20 = vld [vmem:[#allocation2 + $0x68] sm:$0xff]  }
  0x2c   :  { %v1553_v14 = vld [vmem:[#allocation2 + $0x18] sm:$0xff]   ;;  %v1557_v18 = vld [vmem:[#allocation2 + $0x20] sm:$0xff]   ;;  %v1560_v21 = vld [vmem:[#allocation2 + $0xe8] sm:$0xff]  }
  0x2d   :  { %1417 = vmatpush3.bf16.msra.mxu0 %v1545_v6  ;;  %v1554_v15 = vld [vmem:[#allocation2 + $0x98] sm:$0xff]   ;;  %v1558_v19 = vld [vmem:[#allocation2 + $0xa0] sm:$0xff]   ;;  %v1561_v22 = vld [vmem:[#allocation2 + $0x28] sm:$0xff]  }
  0x2e   :  { %1457 = vmatpush3.bf16.msra.mxu1 %v1546_v7  ;;  %1418 = vmatprep.subr.bf16.mxu0 %v1547_v8  ;;  %v1562_v23 = vld [vmem:[#allocation2 + $0xa8] sm:$0xff]   ;;  %v1563_v24 = vld [vmem:[#allocation2 + $0x70] sm:$0xff]   ;;  %v1567_v28 = vld [vmem:[#allocation2 + $0x78] sm:$0xff]  }
  0x2f   :  { %1458 = vmatprep.subr.bf16.mxu1 %v1548_v9  ;;  %v1564_v25 = vld [vmem:[#allocation2 + $0xf0] sm:$0xff]   ;;  %v1568_v29 = vld [vmem:[#allocation2 + $0xf8] sm:$0xff]   ;;  %v53_v32 = vld [vmem:[%s2529_s0 + $0x8] sm:$0xff] }
  0x30   :  { %v1565_v26 = vld [vmem:[#allocation2 + $0x30] sm:$0xff]   ;;  %v1569_v30 = vld [vmem:[#allocation2 + $0x38] sm:$0xff]   ;;  %v57_v33 = vld [vmem:[%s2529_s0 + $0x28] sm:$0xff]  ;;  %v85_v35 = vmax.f32 %v53_v32, 0.0 }
  0x31   :  { %1419 = vmatpush3.bf16.msra.mxu0 %v1549_v10  ;;  %v1566_v27 = vld [vmem:[#allocation2 + $0xb0] sm:$0xff]   ;;  %v1570_v31 = vld [vmem:[#allocation2 + $0xb8] sm:$0xff]   ;;  %v89_v36 = vmax.f32 %v57_v33, 0.0  ;;  %v52_v39 = vld [vmem:[%s2529_s0] sm:$0xff] }
  0x32   :  { %1459 = vmatpush3.bf16.msra.mxu1 %v1550_v11  ;;  %1420 = vmatprep.subr.bf16.mxu0 %v1551_v12  ;;  %v55_v34 = vld [vmem:[%s2529_s0 + $0x18] sm:$0xff]  ;;  %v56_v40 = vld [vmem:[%s2529_s0 + $0x20] sm:$0xff]  ;;  %v84_v42 = vmax.f32 %v52_v39, 0.0  ;;  %v54_v44 = vld [vmem:[%s2529_s0 + $0x10] sm:$0xff] }
  0x33   :  { %1460 = vmatprep.subr.bf16.mxu1 %v1552_v13  ;;  %v59_v37 = vld [vmem:[%s2529_s0 + $0x38] sm:$0xff]  ;;  %v87_v38 = vmax.f32 %v55_v34, 0.0  ;;  %v88_v43 = vmax.f32 %v56_v40, 0.0  ;;  %v58_v45 = vld [vmem:[%s2529_s0 + $0x30] sm:$0xff]  ;;  %v61_v46 = vld [vmem:[%s2529_s0 + $0x48] sm:$0xff]  ;;  %v117_v47 = vpack.c.bf16 %v89_v36, %v85_v35  ;;  %v86_v48 = vmax.f32 %v54_v44, 0.0 }
  0x34   :  { %v91_v41 = vmax.f32 %v59_v37, 0.0  ;;  %v90_v49 = vmax.f32 %v58_v45, 0.0  ;;  %v65_v50 = vld [vmem:[%s2529_s0 + $0x68] sm:$0xff]  ;;  %v93_v51 = vmax.f32 %v61_v46, 0.0  ;;  %v63_v52 = vld [vmem:[%s2529_s0 + $0x58] sm:$0xff]  ;;  %v60_v58 = vld [vmem:[%s2529_s0 + $0x40] sm:$0xff] }
  0x35   :  { %1421 = vmatpush3.bf16.msra.mxu0 %v1553_v14  ;;  %v67_v53 = vld [vmem:[%s2529_s0 + $0x78] sm:$0xff]  ;;  %v116_v55 = vpack.c.bf16 %v88_v43, %v84_v42  ;;  %v97_v56 = vmax.f32 %v65_v50, 0.0  ;;  %v95_v57 = vmax.f32 %v63_v52, 0.0  ;;  %v64_v59 = vld [vmem:[%s2529_s0 + $0x60] sm:$0xff]  ;;  %v62_v60 = vld [vmem:[%s2529_s0 + $0x50] sm:$0xff]  ;;  %420 = vmatprep.mubr.bf16.mxu0 %v117_v47  ;;  %v92_v3 = vmax.f32 %v60_v58, 0.0 }
  0x36   :  { %1461 = vmatpush3.bf16.msra.mxu1 %v1554_v15  ;;  %1422 = vmatprep.subr.bf16.mxu0 %v1555_v16  ;;  %v119_v54 = vpack.c.bf16 %v91_v41, %v87_v38  ;;  %v118_v61 = vpack.c.bf16 %v90_v49, %v86_v48  ;;  %v99_v62 = vmax.f32 %v67_v53, 0.0  ;;  %v66_v63 = vld [vmem:[%s2529_s0 + $0x70] sm:$0xff]  ;;  %v69_v0 = vld [vmem:[%s2529_s0 + $0x88] sm:$0xff]  ;;  %v96_v4 = vmax.f32 %v64_v59, 0.0  ;;  %v71_v6 = vld [vmem:[%s2529_s0 + $0x98] sm:$0xff] }
  0x37   :  { %1462 = vmatprep.subr.bf16.mxu1 %v1556_v17  ;;  %v73_v1 = vld [vmem:[%s2529_s0 + $0xa8] sm:$0xff]  ;;  %v121_v2 = vpack.c.bf16 %v97_v56, %v93_v51  ;;  %v94_v5 = vmax.f32 %v62_v60, 0.0  ;;  %v75_v7 = vld [vmem:[%s2529_s0 + $0xb8] sm:$0xff]  ;;  %v98_v9 = vmax.f32 %v66_v63, 0.0  ;;  %v101_v10 = vmax.f32 %v69_v0, 0.0  ;;  %v68_v14 = vld [vmem:[%s2529_s0 + $0x80] sm:$0xff] }
  0x38   :  { %485 = vmatprep.mubr.bf16.mxu1 %v119_v54  ;;  %v123_v8 = vpack.c.bf16 %v99_v62, %v95_v57  ;;  %v105_v11 = vmax.f32 %v73_v1, 0.0  ;;  %v103_v12 = vmax.f32 %v71_v6, 0.0  ;;  %v107_v13 = vmax.f32 %v75_v7, 0.0  ;;  %v72_v15 = vld [vmem:[%s2529_s0 + $0xa0] sm:$0xff]  ;;  %v70_v16 = vld [vmem:[%s2529_s0 + $0x90] sm:$0xff] }
  0x39   :  { %1423 = vmatpush3.bf16.msra.mxu0 %v1557_v18  ;;  %v74_v17 = vld [vmem:[%s2529_s0 + $0xb0] sm:$0xff]  ;;  %v120_v18 = vpack.c.bf16 %v96_v4, %v92_v3  ;;  %v76_v34 = vld [vmem:[%s2529_s0 + $0xc0] sm:$0xff]  ;;  %v1577_v51 = vld [vmem:[%s2531_s2 + $0x1c] ss:$12 sps:$4 sm:$0xff]  }
  0x3a   :  { %1463 = vmatpush3.bf16.msra.mxu1 %v1558_v19  ;;  %1424 = vmatprep.subr.bf16.mxu0 %v1559_v20  ;;  %v77_v19 = vld [vmem:[%s2529_s0 + $0xc8] sm:$0xff]  ;;  %v80_v35 = vld [vmem:[%s2529_s0 + $0xe0] sm:$0xff]  ;;  %v78_v37 = vld [vmem:[%s2529_s0 + $0xd0] sm:$0xff]  ;;  %v108_v42 = vmax.f32 %v76_v34, 0.0 }
  0x3b   :  { %1464 = vmatprep.subr.bf16.mxu1 %v1560_v21  ;;  %v81_v20 = vld [vmem:[%s2529_s0 + $0xe8] sm:$0xff]  ;;  %v122_v21 = vpack.c.bf16 %v98_v9, %v94_v5  ;;  %v82_v38 = vld [vmem:[%s2529_s0 + $0xf0] sm:$0xff]  ;;  %v112_v43 = vmax.f32 %v80_v35, 0.0  ;;  %v110_v44 = vmax.f32 %v78_v37, 0.0  ;;  %v1575_v52 = vld [vmem:[%s2531_s2 + $0x18] ss:$12 sps:$4 sm:$0xff]  }
  0x3c   :  { %v114_v45 = vmax.f32 %v82_v38, 0.0  ;;  %v1573_v48 = vld [vmem:[%s2531_s2 + $0x4] ss:$12 sps:$4 sm:$0xff]   ;;  %v1571_v49 = vld [vmem:[%s2531_s2] ss:$12 sps:$4 sm:$0xff]  }
  0x3d   :  { %1425 = vmatpush3.bf16.msra.mxu0 %v1561_v22  ;;  %v125_v22 = vpack.c.bf16 %v105_v11, %v101_v10  ;;  %v128_v46 = vpack.c.bf16 %v112_v43, %v108_v42  ;;  %v1574_v50 = vld [vmem:[%s2531_s2 + $0x8] ss:$12 sps:$4 sm:$0xff]   ;;  %v1578_v53 = vld [vmem:[%s2531_s2 + $0x20] ss:$12 sps:$4 sm:$0xff]   ;;  %v1582_v56 = vld [vmem:[%s2531_s2 + $0x38] ss:$12 sps:$4 sm:$0xff]  }
  0x3e   :  { %1465 = vmatpush3.bf16.msra.mxu1 %v1562_v23  ;;  %1426 = vmatprep.subr.bf16.mxu0 %v1563_v24  ;;  %v79_v23 = vld [vmem:[%s2529_s0 + $0xd8] sm:$0xff]  ;;  %v130_v47 = vpack.c.bf16 %v114_v45, %v110_v44  ;;  %v1581_v54 = vld [vmem:[%s2531_s2 + $0x34] ss:$12 sps:$4 sm:$0xff]   ;;  %v1589_v60 = vld [vmem:[%s2531_s2 + $0x64] ss:$12 sps:$4 sm:$0xff]  }
  0x3f   :  { %1466 = vmatprep.subr.bf16.mxu1 %v1564_v25  ;;  %v83_v24 = vld [vmem:[%s2529_s0 + $0xf8] sm:$0xff]  ;;  %v127_v25 = vpack.c.bf16 %v107_v13, %v103_v12  ;;  %v111_v32 = vmax.f32 %v79_v23, 0.0  ;;  %v1583_v58 = vld [vmem:[%s2531_s2 + $0x48] ss:$12 sps:$4 sm:$0xff]   ;;  %v1594_v1 = vld [vmem:[%s2531_s2 + $0x80] ss:$12 sps:$4 sm:$0xff]  }
  0x40   :  { %v115_v33 = vmax.f32 %v83_v24, 0.0  ;;  %v1585_v57 = vld [vmem:[%s2531_s2 + $0x4c] ss:$12 sps:$4 sm:$0xff]   ;;  %v1586_v59 = vld [vmem:[%s2531_s2 + $0x50] ss:$12 sps:$4 sm:$0xff]   ;;  %s1661_s0 = smov 32  }
  0x41   :  { %1427 = vmatpush3.bf16.msra.mxu0 %v1565_v26  ;;  %v100_v26 = vmax.f32 %v68_v14, 0.0  ;;  %v1590_v62 = vld [vmem:[%s2531_s2 + $0x68] ss:$12 sps:$4 sm:$0xff]   ;;  %v1591_v0 = vld [vmem:[%s2531_s2 + $0x78] ss:$12 sps:$4 sm:$0xff]  }
  0x42   :  { %1467 = vmatpush3.bf16.msra.mxu1 %v1566_v27  ;;  %1428 = vmatprep.subr.bf16.mxu0 %v1567_v28  ;;  %v104_v27 = vmax.f32 %v72_v15, 0.0  ;;  %v102_v28 = vmax.f32 %v70_v16, 0.0  ;;  %v131_v41 = vpack.c.bf16 %v115_v33, %v111_v32  ;;  %v1593_v63 = vld [vmem:[%s2531_s2 + $0x7c] ss:$12 sps:$4 sm:$0xff]   ;;  %v1598_v4 = vld [vmem:[%s2531_s2 + $0x98] ss:$12 sps:$4 sm:$0xff]  }
  0x43   :  { %1468 = vmatprep.subr.bf16.mxu1 %v1568_v29  ;;  %v106_v29 = vmax.f32 %v74_v17, 0.0  ;;  %v1595_v3 = vld [vmem:[%s2531_s2 + $0x90] ss:$12 sps:$4 sm:$0xff]   ;;  %v1601_v5 = vld [vmem:[%s2531_s2 + $0xac] ss:$12 sps:$4 sm:$0xff]  }
  0x44   :  { %v124_v36 = vpack.c.bf16 %v104_v27, %v100_v26  ;;  %v1602_v6 = vld [vmem:[%s2531_s2 + $0xb0] ss:$12 sps:$4 sm:$0xff]   ;;  %v1599_v7 = vld [vmem:[%s2531_s2 + $0xa8] ss:$12 sps:$4 sm:$0xff]  }
  0x45   :  { %1429 = vmatpush3.bf16.msra.mxu0 %v1569_v30  ;;  %v109_v30 = vmax.f32 %v77_v19, 0.0  ;;  %v126_v39 = vpack.c.bf16 %v106_v29, %v102_v28 }
  0x46   :  { %1469 = vmatpush3.bf16.msra.mxu1 %v1570_v31  ;;  %v113_v31 = vmax.f32 %v81_v20, 0.0  ;;  %763 = vmatprep.subr.bf16.mxu0 %v1573_v48 }
  0x47   :  { %1506 = vmatprep.subr.bf16.mxu1 %v1574_v50 }
  0x48   :  { %421 = vmatmul.mubr.bf16.vlgmr.msra.gmra.mrb[0].mxu0 %v116_v55  ;;  %v129_v40 = vpack.c.bf16 %v113_v31, %v109_v30  ;;  %v1579_v55 = vld [vmem:[%s2531_s2 + $0x30] ss:$12 sps:$4 sm:$0xff]  }
  0x49   :  { %486 = vmatmul.mubr.bf16.vlgmr.msra.gmra.mrb[0].mxu1 %v118_v61  ;;  %428 = vmatprep.mubr.bf16.mxu0 %v121_v2  ;;  %v1587_v61 = vld [vmem:[%s2531_s2 + $0x60] ss:$12 sps:$4 sm:$0xff]  }
  0x4a   :  { %493 = vmatprep.mubr.bf16.mxu1 %v123_v8  ;;  %764 = vmatpush1.bf16.msra.mxu0 %v1571_v49  ;;  %v1597_v2 = vld [vmem:[%s2531_s2 + $0x94] ss:$12 sps:$4 sm:$0xff]   ;;  %v1659_v8 = vmov 0  }
  0x4b   :  { %1507 = vmatpush3.bf16.msra.mxu1 %v1574_v50  ;;  %765 = vmatprep.subr.bf16.mxu0 %v1577_v51 }
  0x4c   :  { %1508 = vmatprep.subr.bf16.mxu1 %v1578_v53 }
  0x4e   :  { %766 = vmatpush1.bf16.msra.mxu0 %v1575_v52 }
  0x4f   :  { %1509 = vmatpush3.bf16.msra.mxu1 %v1578_v53  ;;  %767 = vmatprep.subr.bf16.mxu0 %v1581_v54 }
  0x50   :  { %429 = vmatmul.mubr.bf16.gmra.mrb[4].mxu0 %v120_v18  ;;  %1510 = vmatprep.subr.bf16.mxu1 %v1582_v56 }
  0x51   :  { %494 = vmatmul.mubr.bf16.gmra.mrb[4].mxu1 %v122_v21  ;;  %436 = vmatprep.mubr.bf16.mxu0 %v125_v22 }
  0x52   :  { %501 = vmatprep.mubr.bf16.mxu1 %v127_v25  ;;  %768 = vmatpush1.bf16.msra.mxu0 %v1579_v55 }
  0x53   :  { %1511 = vmatpush3.bf16.msra.mxu1 %v1582_v56  ;;  %769 = vmatprep.subr.bf16.mxu0 %v1585_v57 }
  0x54   :  { %1512 = vmatprep.subr.bf16.mxu1 %v1586_v59 }
  0x56   :  { %770 = vmatpush1.bf16.msra.mxu0 %v1583_v58 }
  0x57   :  { %1513 = vmatpush3.bf16.msra.mxu1 %v1586_v59  ;;  %771 = vmatprep.subr.bf16.mxu0 %v1589_v60 }
  0x58   :  { %437 = vmatmul.mubr.bf16.gmra.mrb[8].mxu0 %v124_v36  ;;  %1514 = vmatprep.subr.bf16.mxu1 %v1590_v62 }
  0x59   :  { %502 = vmatmul.mubr.bf16.gmra.mrb[8].mxu1 %v126_v39  ;;  %444 = vmatprep.mubr.bf16.mxu0 %v129_v40 }
  0x5a   :  { %509 = vmatprep.mubr.bf16.mxu1 %v131_v41  ;;  %772 = vmatpush1.bf16.msra.mxu0 %v1587_v61 }
  0x5b   :  { %1515 = vmatpush3.bf16.msra.mxu1 %v1590_v62  ;;  %773 = vmatprep.subr.bf16.mxu0 %v1593_v63 }
  0x5c   :  { %1516 = vmatprep.subr.bf16.mxu1 %v1594_v1 }
  0x5e   :  { %774 = vmatpush1.bf16.msra.mxu0 %v1591_v0 }
  0x5f   :  { %1517 = vmatpush3.bf16.msra.mxu1 %v1594_v1  ;;  %775 = vmatprep.subr.bf16.mxu0 %v1597_v2 }
  0x60   :  { %445 = vmatmul.mubr.bf16.gmra.mrb[12].mxu0 %v128_v46  ;;  %1518 = vmatprep.subr.bf16.mxu1 %v1598_v4 }
  0x61   :  { %510 = vmatmul.mubr.bf16.gmra.mrb[12].mxu1 %v130_v47  ;;  %795 = vmatprep.mubr.bf16.mxu0 %v1659_v8 }
  0x62   :  { %776 = vmatpush1.bf16.msra.mxu0 %v1595_v3 }
  0x63   :  { %1519 = vmatpush3.bf16.msra.mxu1 %v1598_v4  ;;  %777 = vmatprep.subr.bf16.mxu0 %v1601_v5 }
  0x64   :  { %1520 = vmatprep.subr.bf16.mxu1 %v1602_v6 }
  0x66   :  { %778 = vmatpush1.bf16.msra.mxu0 %v1599_v7 }
  0x67   :  { %1521 = vmatpush3.bf16.msra.mxu1 %v1602_v6 }
 0x11b   :  { %v1430_v9 = vpop.f32.mrb[0].mxu0 }
 0x11c   :  { %v1470_v10 = vpop.f32.mrb[0].mxu1  ;;  %v1431_v11 = vpop.f32.mrb[1].mxu0 }
 0x11d   :  { %v1432_v12 = vadd.f32 %v1431_v11, %v1430_v9  ;;  %v1471_v13 = vpop.f32.mrb[1].mxu1  ;;  %v1433_v14 = vpop.f32.mrb[2].mxu0 }
 0x11e   :  { %v1472_v15 = vadd.f32 %v1471_v13, %v1470_v10  ;;  %v1473_v16 = vpop.f32.mrb[2].mxu1  ;;  %v1434_v17 = vpop.f32.mrb[3].mxu0 }
 0x11f   :  { %v1435_v18 = vadd.f32 %v1434_v17, %v1433_v14  ;;  %v1474_v19 = vpop.f32.mrb[3].mxu1 }
 0x120   :  { %v1892_v20 = vadd.f32 %v1472_v15, %v1432_v12  ;;  %v1475_v21 = vadd.f32 %v1474_v19, %v1473_v16 }
 0x122   :  { %v1894_v22 = vadd.f32 %v1475_v21, %v1435_v18  ;;  %v531_v24 = vmul.f32 %v1892_v20, %v1892_v20 }
 0x123   :  { %v1436_v23 = vpop.f32.mrb[4].mxu0 }
 0x124   :  { %v518_v25 = vadd.f32 %v1894_v22, %v1892_v20  ;;  %v532_v26 = vmul.f32 %v1894_v22, %v1894_v22  ;;  %v1476_v27 = vpop.f32.mrb[4].mxu1  ;;  %v1437_v28 = vpop.f32.mrb[5].mxu0 }
 0x125   :  { %v1438_v29 = vadd.f32 %v1437_v28, %v1436_v23  ;;  %v1477_v30 = vpop.f32.mrb[5].mxu1  ;;  %v1439_v31 = vpop.f32.mrb[6].mxu0 }
 0x126   :  { %v539_v32 = vadd.f32 %v532_v26, %v531_v24  ;;  %v1478_v33 = vadd.f32 %v1477_v30, %v1476_v27  ;;  %v1479_v34 = vpop.f32.mrb[6].mxu1  ;;  %v1440_v35 = vpop.f32.mrb[7].mxu0 }
 0x127   :  { %v1441_v36 = vadd.f32 %v1440_v35, %v1439_v31  ;;  %v1480_v37 = vpop.f32.mrb[7].mxu1 }
 0x128   :  { %v1902_v38 = vadd.f32 %v1478_v33, %v1438_v29  ;;  %v1481_v39 = vadd.f32 %v1480_v37, %v1479_v34 }
 0x12a   :  { %v519_v40 = vadd.f32 %v518_v25, %v1902_v38  ;;  %v533_v41 = vmul.f32 %v1902_v38, %v1902_v38  ;;  %v1907_v42 = vadd.f32 %v1481_v39, %v1441_v36 }
 0x12b   :  { %v1442_v43 = vpop.f32.mrb[8].mxu0 }
 0x12c   :  { %v540_v44 = vadd.f32 %v539_v32, %v533_v41  ;;  %v520_v45 = vadd.f32 %v519_v40, %v1907_v42  ;;  %v534_v46 = vmul.f32 %v1907_v42, %v1907_v42  ;;  %v1482_v47 = vpop.f32.mrb[8].mxu1  ;;  %v1443_v48 = vpop.f32.mrb[9].mxu0 }
 0x12d   :  { %v1444_v49 = vadd.f32 %v1443_v48, %v1442_v43  ;;  %v1483_v50 = vpop.f32.mrb[9].mxu1  ;;  %v1445_v51 = vpop.f32.mrb[10].mxu0 }
 0x12e   :  { %v541_v52 = vadd.f32 %v540_v44, %v534_v46  ;;  %v1484_v53 = vadd.f32 %v1483_v50, %v1482_v47  ;;  %v1485_v54 = vpop.f32.mrb[10].mxu1  ;;  %v1446_v55 = vpop.f32.mrb[11].mxu0  ;;  %v556_v47 = vld [vmem:[%s2532_s3] sm:$0x1]  ;;  %s1660_s3 = smov 96  }
 0x12f   :  { %v1447_v56 = vadd.f32 %v1446_v55, %v1445_v51  ;;  %v1486_v57 = vpop.f32.mrb[11].mxu1  ;;  %v560_v51 = vld [vmem:[%s2533_s4] sm:$0x1] }
 0x130   :  { %v504_v58 = vadd.f32 %v1484_v53, %v1444_v49  ;;  %v1487_v59 = vadd.f32 %v1486_v57, %v1485_v54 }
 0x132   :  { %v521_v60 = vadd.f32 %v520_v45, %v504_v58  ;;  %v535_v61 = vmul.f32 %v504_v58, %v504_v58  ;;  %v507_v62 = vadd.f32 %v1487_v59, %v1447_v56  ;;  %v564_v45 = vlaneseq }
 0x133   :  { %v1448_v63 = vpop.f32.mrb[12].mxu0 }
 0x134   :  { %v542_v0 = vadd.f32 %v541_v52, %v535_v61  ;;  %v522_v1 = vadd.f32 %v521_v60, %v507_v62  ;;  %v536_v2 = vmul.f32 %v507_v62, %v507_v62  ;;  %v1488_v3 = vpop.f32.mrb[12].mxu1  ;;  %v1449_v4 = vpop.f32.mrb[13].mxu0  ;;  %v565_v46 = vshrl.u32 %v564_v45, 7 }
 0x135   :  { %v1450_v5 = vadd.f32 %v1449_v4, %v1448_v63  ;;  %v1489_v6 = vpop.f32.mrb[13].mxu1  ;;  %v1451_v7 = vpop.f32.mrb[14].mxu0 }
 0x136   :  { %v543_v9 = vadd.f32 %v542_v0, %v536_v2  ;;  %v1490_v10 = vadd.f32 %v1489_v6, %v1488_v3  ;;  %v1491_v11 = vpop.f32.mrb[14].mxu1  ;;  %v1452_v12 = vpop.f32.mrb[15].mxu0  ;;  %v566_v48 = vsub.s32 0, %v565_v46 }
 0x137   :  { %v1453_v13 = vadd.f32 %v1452_v12, %v1451_v7  ;;  %v1492_v14 = vpop.f32.mrb[15].mxu1 }
 0x138   :  { %v512_v15 = vadd.f32 %v1490_v10, %v1450_v5  ;;  %v1493_v16 = vadd.f32 %v1492_v14, %v1491_v11 }
 0x13a   :  { %v523_v17 = vadd.f32 %v522_v1, %v512_v15  ;;  %v537_v18 = vmul.f32 %v512_v15, %v512_v15  ;;  %v515_v19 = vadd.f32 %v1493_v16, %v1453_v13 }
 0x13c   :  { %v544_v21 = vadd.f32 %v543_v9, %v537_v18  ;;  %v524_v23 = vadd.f32 %v523_v17, %v515_v19  ;;  %v538_v24 = vmul.f32 %v515_v19, %v515_v19  ;;  %v900_v17 = vld [vmem:[#allocation4] sm:$0xff]  ;;  %v901_v18 = vld [vmem:[#allocation4 + $0x8] sm:$0xff] }
 0x13e   :  { %v525_v25 = vrot.slane %v524_v23, 4  ;;  %v545_v26 = vadd.f32 %v544_v21, %v538_v24  ;;  %v902_v21 = vld [vmem:[#allocation4 + $0x18] sm:$0xff] }
 0x140   :  { %v526_v27 = vadd.f32 %v525_v25, %v524_v23  ;;  %v546_v28 = vrot.slane %v545_v26, 4 }
 0x142   :  { %v527_v29 = vrot.slane %v526_v27, 2  ;;  %v547_v30 = vadd.f32 %v546_v28, %v545_v26  ;;  %v903_v26 = vld [vmem:[#allocation4 + $0x20] sm:$0xff] }
 0x144   :  { %v528_v31 = vadd.f32 %v527_v29, %v526_v27  ;;  %v548_v32 = vrot.slane %v547_v30, 2 }
 0x146   :  { %v529_v33 = vrot.slane %v528_v31, 1  ;;  %v549_v34 = vadd.f32 %v548_v32, %v547_v30 }
 0x148   :  { %v530_v35 = vadd.f32 %v529_v33, %v528_v31  ;;  %v550_v36 = vrot.slane %v549_v34, 1 }
 0x14a   :  { %v551_v37 = vadd.f32 %v550_v36, %v549_v34  ;;  %v552_v39 = vmul.f32 0.020408163, %v530_v35 }
 0x14c   :  { %v553_v40 = vmul.f32 0.020408163, %v551_v37  ;;  %v554_v41 = vmul.f32 %v552_v39, %v552_v39 }
 0x14e   :  { %v555_v43 = vsub.f32 %v553_v40, %v554_v41  ;;  %v906_v41 = vld [vmem:[#allocation4 + $0x38] sm:$0xff] }
 0x150   :  { %v557_v44 = vadd.f32 1e-05, %v555_v43 }
 0x152   :  { %1603 = vrsqrt.f32 %v557_v44  ;;  %v905_v44 = vld [vmem:[#allocation4 + $0x30] sm:$0xff] }
 0x15c   :  { %v1604_v49 = vpop.eup %1603 }
 0x15d   :  { %v559_v50 = vmul.f32 %v1604_v49, %v556_v47 }
 0x15f   :  { %v561_v52 = vmul.f32 %v559_v50, %v552_v39  ;;  %v567_v53 = vrot.slane %v559_v50, %v566_v48  ;;  %v909_v50 = vld [vmem:[#allocation4 + $0x50] sm:$0xff] }
 0x161   :  { %v562_v54 = vsub.f32 %v560_v51, %v561_v52  ;;  %v576_v55 = vmul.f32 %v567_v53, %v515_v19  ;;  %v569_v56 = vmul.f32 %v567_v53, %v1892_v20  ;;  %v570_v57 = vmul.f32 %v567_v53, %v1894_v22 }
 0x162   :  { %v571_v59 = vmul.f32 %v567_v53, %v1902_v38  ;;  %v572_v60 = vmul.f32 %v567_v53, %v1907_v42  ;;  %v573_v61 = vmul.f32 %v567_v53, %v504_v58  ;;  %v574_v63 = vmul.f32 %v567_v53, %v507_v62 }
 0x163   :  { %v581_v0 = vrot.slane %v562_v54, %v566_v48  ;;  %v575_v1 = vmul.f32 %v567_v53, %v512_v15 }
 0x165   :  { %v583_v2 = vadd.f32 %v581_v0, %v569_v56  ;;  %v584_v3 = vadd.f32 %v581_v0, %v570_v57  ;;  %v585_v4 = vadd.f32 %v581_v0, %v571_v59  ;;  %v586_v5 = vadd.f32 %v581_v0, %v572_v60  ;;  %v908_v57 = vld [vmem:[#allocation4 + $0x48] sm:$0xff] }
 0x166   :  { %v587_v6 = vadd.f32 %v581_v0, %v573_v61  ;;  %v588_v7 = vadd.f32 %v581_v0, %v574_v63  ;;  %v589_v9 = vadd.f32 %v581_v0, %v575_v1  ;;  %v590_v10 = vadd.f32 %v581_v0, %v576_v55 }
 0x167   :  { %v591_v11 = vmax.f32 %v583_v2, 0.0  ;;  %v592_v20 = vmax.f32 %v584_v3, 0.0  ;;  %v593_v12 = vmax.f32 %v585_v4, 0.0  ;;  %v594_v22 = vmax.f32 %v586_v5, 0.0 }
 0x168   :  { %v595_v13 = vmax.f32 %v587_v6, 0.0  ;;  %v596_v38 = vmax.f32 %v588_v7, 0.0  ;;  %v597_v14 = vmax.f32 %v589_v9, 0.0  ;;  %v598_v42 = vmax.f32 %v590_v10, 0.0  ;;  %v912_v7 = vld [vmem:[#allocation4 + $0x68] sm:$0xff] }
 0x169   :  { %v599_v58 = vpack.c.bf16 %v592_v20, %v591_v11  ;;  %v600_v62 = vpack.c.bf16 %v594_v22, %v593_v12 }
 0x16a   :  { %v601_v16 = vpack.c.bf16 %v596_v38, %v595_v13  ;;  %v602_v15 = vpack.c.bf16 %v598_v42, %v597_v14  ;;  %v915_v13 = vld [vmem:[#allocation4 + $0x80] sm:$0xff] }
 0x16b   :  { %796 = vmatmul.mubr.bf16.vlgmr.msra.gmra.mrb[16].mxu0 %v599_v58  ;;  %1522 = vmatprep.mubr.bf16.mxu1 %v599_v58 }
 0x16c   :  { %1523 = vmatmul.mubr.bf16.vlgmr.msra.gmra.mrb[16].mxu1 %v600_v62  ;;  %805 = vmatprep.mubr.bf16.mxu0 %v1659_v8 }
 0x16d   :  { %1526 = vmatprep.mubr.bf16.mxu1 %v601_v16 }
 0x173   :  { %806 = vmatmul.mubr.bf16.gmra.mrb[20].mxu0 %v600_v62 }
 0x174   :  { %1527 = vmatmul.mubr.bf16.gmra.mrb[20].mxu1 %v602_v15  ;;  %815 = vmatprep.mubr.bf16.mxu0 %v1659_v8 }
 0x17b   :  { %816 = vmatmul.mubr.bf16.gmra.mrb[24].mxu0 %v601_v16 }
 0x17c   :  { %825 = vmatprep.mubr.bf16.mxu0 %v1659_v8 }
 0x183   :  { %826 = vmatmul.mubr.bf16.gmra.mrb[28].mxu0 %v602_v15 }
 0x23e   :  { %v797_v19 = vpop.f32.mrb[16].mxu0 }
 0x23f   :  { %v923_v23 = vmul.f32 %v900_v17, %v797_v19  ;;  %v799_v24 = vpop.f32.mrb[17].mxu0  ;;  %v1925_v25 = vpop.f32.mrb[16].mxu1 }
 0x240   :  { %v924_v27 = vmul.f32 %v901_v18, %v799_v24  ;;  %v801_v28 = vpop.f32.mrb[18].mxu0  ;;  %v870_v29 = vpop.f32.mrb[17].mxu1 }
 0x241   :  { %v1927_v30 = vmul.f32 %v902_v21, %v801_v28  ;;  %v1929_v31 = vpop.f32.mrb[18].mxu1  ;;  %992 = vrot.lane.b32.xlu0 %v923_v23, %s1660_s3  ;;  %v803_v8 = vpop.f32.mrb[19].mxu0  ;;  %v918_v29 = vld [vmem:[#allocation4 + $0x98] sm:$0xff] }
 0x242   :  { %947 = vst.msk [vmem:[%s2535_s6] sm:$0xff] %vm946_vm0, %v924_v27  ;;  %v926_v32 = vmul.f32 %v903_v26, %v803_v8  ;;  %v1936_v33 = vpop.f32.mrb[19].mxu1  ;;  %v1148_v34 = vrot.slane %v924_v27, 1  ;;  %v1212_v35 = vrot.slane %v924_v27, 6  ;;  %v1276_v39 = vrot.slane %v924_v27, 7 }
 0x243   :  { %1043 = vrot.lane.b32.xlu1 %v1927_v30, %s1654_s7 }
 0x244   :  { %948 = vst.msk [vmem:[%s2535_s6 + $0x8] sm:$0xff] %vm946_vm0, %v926_v32  ;;  %v1149_v36 = vrot.slane %v926_v32, 1  ;;  %v1213_v37 = vrot.slane %v926_v32, 6  ;;  %v1277_v40 = vrot.slane %v926_v32, 7 }
 0x245   :  { %1041 = vrot.lane.b32.xlu0 %v923_v23, %s1654_s7 }
 0x246   :  { %v807_v43 = vpop.f32.mrb[20].mxu0  ;;  %v1150_v45 = vsel %vm1147_vm1, %v1148_v34, %v1149_v36  ;;  %v1947_v46 = vsel %vm1211_vm2, %v1212_v35, %v1213_v37  ;;  %v1950_v47 = vsel %vm1275_vm3, %v1276_v39, %v1277_v40  ;;  %v911_v34 = vld [vmem:[#allocation4 + $0x60] sm:$0xff]  ;;  %v921_v39 = vld [vmem:[#allocation4 + $0xb0] sm:$0xff] }
 0x247   :  { %v1952_v48 = vpop.f32.mrb[20].mxu1  ;;  %1092 = vrot.lane.b32.xlu1 %v1927_v30, %s1661_s0  ;;  %v809_v49 = vpop.f32.mrb[21].mxu0  ;;  %v1958_v54 = vmul.f32 %v905_v44, %v807_v43 }
 0x248   :  { %v929_v51 = vmul.f32 %v906_v41, %v809_v49  ;;  %v811_v52 = vpop.f32.mrb[22].mxu0  ;;  %v1956_v53 = vpop.f32.mrb[21].mxu1 }
 0x249   :  { %v1960_v55 = vpop.f32.mrb[22].mxu1  ;;  %1090 = vrot.lane.b32.xlu0 %v923_v23, %s1661_s0  ;;  %v813_v56 = vpop.f32.mrb[23].mxu0  ;;  %v931_v6 = vmul.f32 %v908_v57, %v811_v52  ;;  %v914_v52 = vld [vmem:[#allocation4 + $0x78] sm:$0xff] }
 0x24a   :  { %949 = vst.msk [vmem:[%s2535_s6 + $0x10] sm:$0xff] %vm946_vm0, %v929_v51  ;;  %v932_v59 = vmul.f32 %v909_v50, %v813_v56  ;;  %v1967_v60 = vpop.f32.mrb[23].mxu1  ;;  %v1151_v61 = vrot.slane %v929_v51, 1  ;;  %v1215_v63 = vrot.slane %v929_v51, 6  ;;  %v1279_v1 = vrot.slane %v929_v51, 7 }
 0x24b   :  { %v955_v0 = vld [vmem:[%s2535_s6 + $0x8] sm:$0xff]  ;;  %996 = vrot.lane.b32.xlu1 %v1958_v54, %s1660_s3 }
 0x24c   :  { %v962_v2 = vadd.f32 %v955_v0, %v923_v23  ;;  %950 = vst.msk [vmem:[%s2535_s6 + $0x18] sm:$0xff] %vm946_vm0, %v932_v59  ;;  %v1152_v3 = vsel %vm1147_vm1, %v1149_v36, %v1151_v61  ;;  %v1153_v4 = vrot.slane %v932_v59, 1  ;;  %v1980_v5 = vsel %vm1211_vm2, %v1213_v37, %v1215_v63 }
 0x24d   :  { %994 = vrot.lane.b32.xlu0 %v1927_v30, %s1660_s3  ;;  %v1217_v9 = vrot.slane %v932_v59, 6  ;;  %v1985_v10 = vsel %vm1275_vm3, %v1277_v40, %v1279_v1  ;;  %v1281_v11 = vrot.slane %v932_v59, 7 }
 0x24e   :  { %969 = vst.msk [vmem:[%s2535_s6 + $0x8] sm:$0xff] %vm946_vm0, %v962_v2  ;;  %v817_v20 = vpop.f32.mrb[24].mxu0  ;;  %v1992_v12 = vsel %vm1147_vm1, %v1151_v61, %v1153_v4 }
 0x24f   :  { %998 = vrot.lane.b32.xlu1 %v931_v6, %s1660_s3  ;;  %v819_v22 = vpop.f32.mrb[25].mxu0  ;;  %v1996_v38 = vsel %vm1211_vm2, %v1215_v63, %v1217_v9  ;;  %v1999_v14 = vsel %vm1275_vm3, %v1279_v1, %v1281_v11 }
 0x250   :  { %v935_v42 = vmul.f32 %v912_v7, %v819_v22  ;;  %v821_v58 = vpop.f32.mrb[26].mxu0 }
 0x251   :  { %v956_v62 = vld [vmem:[%s2535_s6 + $0x10] sm:$0xff]  ;;  %1163 = vrot.lane.b32.xlu0 %v1150_v45, %s1660_s3  ;;  %v823_v16 = vpop.f32.mrb[27].mxu0  ;;  %v934_v45 = vmul.f32 %v911_v34, %v817_v20 }
 0x252   :  { %v963_v15 = vadd.f32 %v956_v62, %v1927_v30  ;;  %951 = vst.msk [vmem:[%s2535_s6 + $0x20] sm:$0xff] %vm946_vm0, %v935_v42  ;;  %v938_v17 = vmul.f32 %v915_v13, %v823_v16  ;;  %v1155_v18 = vrot.slane %v935_v42, 1  ;;  %v1219_v19 = vrot.slane %v935_v42, 6 }
 0x253   :  { %v957_v21 = vld [vmem:[%s2535_s6 + $0x18] sm:$0xff]  ;;  %1047 = vrot.lane.b32.xlu1 %v931_v6, %s1654_s7  ;;  %v1283_v23 = vrot.slane %v935_v42, 7 }
 0x254   :  { %970 = vst.msk [vmem:[%s2535_s6 + $0x10] sm:$0xff] %vm946_vm0, %v963_v15  ;;  %v964_v24 = vadd.f32 %v957_v21, %v1958_v54  ;;  %952 = vst.msk [vmem:[%s2535_s6 + $0x28] sm:$0xff] %vm946_vm0, %v938_v17  ;;  %v1156_v26 = vsel %vm1147_vm1, %v1153_v4, %v1155_v18  ;;  %v1157_v27 = vrot.slane %v938_v17, 1  ;;  %v2025_v28 = vsel %vm1211_vm2, %v1217_v9, %v1219_v19  ;;  %v920_v15 = vld [vmem:[#allocation4 + $0xa8] sm:$0xff] }
 0x255   :  { %1045 = vrot.lane.b32.xlu0 %v1958_v54, %s1654_s7  ;;  %v1221_v30 = vrot.slane %v938_v17, 6  ;;  %v2030_v8 = vsel %vm1275_vm3, %v1281_v11, %v1283_v23  ;;  %v1285_v32 = vrot.slane %v938_v17, 7  ;;  %v917_v11 = vld [vmem:[#allocation4 + $0x90] sm:$0xff] }
 0x256   :  { %971 = vst.msk [vmem:[%s2535_s6 + $0x18] sm:$0xff] %vm946_vm0, %v964_v24  ;;  %v827_v35 = vpop.f32.mrb[28].mxu0  ;;  %v1158_v36 = vsel %vm1147_vm1, %v1155_v18, %v1157_v27 }
 0x257   :  { %1096 = vrot.lane.b32.xlu1 %v931_v6, %s1661_s0  ;;  %v829_v37 = vpop.f32.mrb[29].mxu0  ;;  %v1222_v40 = vsel %vm1211_vm2, %v1219_v19, %v1221_v30  ;;  %v2040_v41 = vsel %vm1275_vm3, %v1283_v23, %v1285_v32  ;;  %v940_v42 = vmul.f32 %v917_v11, %v827_v35 }
 0x258   :  { %v941_v43 = vmul.f32 %v918_v29, %v829_v37  ;;  %v831_v44 = vpop.f32.mrb[30].mxu0 }
 0x259   :  { %v958_v49 = vld [vmem:[%s2535_s6 + $0x20] sm:$0xff]  ;;  %1094 = vrot.lane.b32.xlu0 %v1958_v54, %s1661_s0  ;;  %v833_v50 = vpop.f32.mrb[31].mxu0  ;;  %v943_v17 = vmul.f32 %v920_v15, %v831_v44 }
 0x25a   :  { %v965_v51 = vadd.f32 %v958_v49, %v931_v6  ;;  %953 = vst.msk [vmem:[%s2535_s6 + $0x30] sm:$0xff] %vm946_vm0, %v941_v43  ;;  %v2051_v56 = vmul.f32 %v921_v39, %v833_v50  ;;  %v1159_v57 = vrot.slane %v941_v43, 1  ;;  %v1223_v59 = vrot.slane %v941_v43, 6 }
 0x25b   :  { %v959_v61 = vld [vmem:[%s2535_s6 + $0x28] sm:$0xff]  ;;  %1165 = vrot.lane.b32.xlu1 %v1152_v3, %s1660_s3  ;;  %v1287_v63 = vrot.slane %v941_v43, 7  ;;  %v937_v3 = vmul.f32 %v914_v52, %v821_v58 }
 0x25c   :  { %972 = vst.msk [vmem:[%s2535_s6 + $0x20] sm:$0xff] %vm946_vm0, %v965_v51  ;;  %v966_v54 = vadd.f32 %v959_v61, %v934_v45  ;;  %954 = vst.msk [vmem:[%s2535_s6 + $0x38] sm:$0xff] %vm946_vm0, %v2051_v56  ;;  %v1160_v0 = vsel %vm1147_vm1, %v1157_v27, %v1159_v57  ;;  %v1224_v1 = vsel %vm1211_vm2, %v1221_v30, %v1223_v59  ;;  %v1161_v2 = vrot.slane %v2051_v56, 1  ;;  %v977_v27 = vld [vmem:[%s2535_s6 + $0xf] sm:$0xff] }
 0x25d   :  { %1000 = vrot.lane.b32.xlu0 %v934_v45, %s1660_s3  ;;  %v1225_v4 = vrot.slane %v2051_v56, 6  ;;  %v1288_v6 = vsel %vm1275_vm3, %v1285_v32, %v1287_v63  ;;  %v1289_v7 = vrot.slane %v2051_v56, 7  ;;  %v978_v21 = vld [vmem:[%s2535_s6 + $0x17] sm:$0xff] }
 0x25e   :  { %973 = vst.msk [vmem:[%s2535_s6 + $0x28] sm:$0xff] %vm946_vm0, %v966_v54  ;;  %v1162_v9 = vsel %vm1147_vm1, %v1159_v57, %v1161_v2 }
 0x25f   :  { %1002 = vrot.lane.b32.xlu1 %v937_v3, %s1660_s3  ;;  %v1226_v20 = vsel %vm1211_vm2, %v1223_v59, %v1225_v4  ;;  %v1290_v22 = vsel %vm1275_vm3, %v1287_v63, %v1289_v7 }
 0x261   :  { %v960_v13 = vld [vmem:[%s2535_s6 + $0x30] sm:$0xff]  ;;  %1049 = vrot.lane.b32.xlu0 %v934_v45, %s1654_s7 }
 0x262   :  { %v967_v58 = vadd.f32 %v960_v13, %v937_v3 }
 0x263   :  { %v961_v62 = vld [vmem:[%s2535_s6 + $0x38] sm:$0xff]  ;;  %1051 = vrot.lane.b32.xlu1 %v937_v3, %s1654_s7 }
 0x264   :  { %974 = vst.msk [vmem:[%s2535_s6 + $0x30] sm:$0xff] %vm946_vm0, %v967_v58  ;;  %v968_v16 = vadd.f32 %v961_v62, %v940_v42  ;;  %v979_v30 = vld [vmem:[%s2535_s6 + $0x1f] sm:$0xff] }
 0x265   :  { %1098 = vrot.lane.b32.xlu0 %v934_v45, %s1661_s0  ;;  %v980_v56 = vld [vmem:[%s2535_s6 + $0x27] sm:$0xff] }
 0x266   :  { %975 = vst.msk [vmem:[%s2535_s6 + $0x38] sm:$0xff] %vm946_vm0, %v968_v16 }
 0x267   :  { %1100 = vrot.lane.b32.xlu1 %v937_v3, %s1661_s0 }
 0x269   :  { %1004 = vrot.lane.b32.xlu0 %v940_v42, %s1660_s3 }
 0x26b   :  { %1169 = vrot.lane.b32.xlu1 %v1156_v26, %s1660_s3  ;;  %v981_v63 = vld [vmem:[%s2535_s6 + $0x2f] sm:$0xff] }
 0x26d   :  { %1167 = vrot.lane.b32.xlu0 %v1992_v12, %s1660_s3  ;;  %v982_v16 = vld [vmem:[%s2535_s6 + $0x37] sm:$0xff] }
 0x26f   :  { %1229 = vrot.lane.b32.xlu1 %v1980_v5, %s1654_s7 }
 0x271   :  { %1171 = vrot.lane.b32.xlu0 %v1158_v36, %s1660_s3 }
 0x273   :  { %1006 = vrot.lane.b32.xlu1 %v943_v17, %s1660_s3 }
 0x275   :  { %1053 = vrot.lane.b32.xlu0 %v940_v42, %s1654_s7 }
 0x277   :  { %1233 = vrot.lane.b32.xlu1 %v2025_v28, %s1654_s7 }
 0x279   :  { %1227 = vrot.lane.b32.xlu0 %v1947_v46, %s1654_s7 }
 0x27b   :  { %1055 = vrot.lane.b32.xlu1 %v943_v17, %s1654_s7 }
 0x27d   :  { %1102 = vrot.lane.b32.xlu0 %v940_v42, %s1661_s0 }
 0x27f   :  { %1104 = vrot.lane.b32.xlu1 %v943_v17, %s1661_s0 }
 0x281   :  { %1231 = vrot.lane.b32.xlu0 %v1996_v38, %s1654_s7 }
 0x283   :  { %1173 = vrot.lane.b32.xlu1 %v1160_v0, %s1660_s3 }
 0x285   :  { %1235 = vrot.lane.b32.xlu0 %v1222_v40, %s1654_s7 }
 0x287   :  { %1237 = vrot.lane.b32.xlu1 %v1224_v1, %s1654_s7 }
 0x289   :  { %1175 = vrot.lane.b32.xlu0 %v1162_v9, %s1660_s3 }
 0x28b   :  { %1177 = vrot.lane.b32.xlu1 %v1161_v2, %s1660_s3 }
 0x28d   :  { %1291 = vrot.lane.b32.xlu0 %v1950_v47, %s1661_s0  ;;  %v976_v47 = vld [vmem:[%s2535_s6 + $0x7] sm:$0xff] }
 0x28f   :  { %1241 = vrot.lane.b32.xlu1 %v1225_v4, %s1654_s7 }
 0x291   :  { %1239 = vrot.lane.b32.xlu0 %v1226_v20, %s1654_s7 }
 0x293   :  { %1293 = vrot.lane.b32.xlu1 %v1985_v10, %s1661_s0 }
 0x295   :  { %1295 = vrot.lane.b32.xlu0 %v1999_v14, %s1661_s0 }
 0x297   :  { %1297 = vrot.lane.b32.xlu1 %v2030_v8, %s1661_s0 }
 0x299   :  { %1299 = vrot.lane.b32.xlu0 %v2040_v41, %s1661_s0 }
 0x29b   :  { %1301 = vrot.lane.b32.xlu1 %v1288_v6, %s1661_s0 }
 0x29d   :  { %1303 = vrot.lane.b32.xlu0 %v1290_v22, %s1661_s0 }
 0x29f   :  { %1305 = vrot.lane.b32.xlu1 %v1289_v7, %s1661_s0 }
 0x2b3   :  { %v993_v46 = vpop.permute.xlu0 %992 }
 0x2b4   :  { %v1016_v5 = vadd.f32 %v993_v46, %v976_v47 }
 0x2b5   :  { %v1044_v10 = vpop.permute.xlu1 %1043 }
 0x2b6   :  { %1024 = vst.msk [vmem:[%s2535_s6 + $0x7] sm:$0xff] %vm946_vm0, %v1016_v5 }
 0x2b7   :  { %v1042_v12 = vpop.permute.xlu0 %1041 }
 0x2b9   :  { %v1093_v38 = vpop.permute.xlu1 %1092 }
 0x2bb   :  { %v1091_v14 = vpop.permute.xlu0 %1090 }
 0x2bd   :  { %v1033_v18 = vld [vmem:[%s2535_s6 + $0x6] sm:$0xff]  ;;  %v997_v19 = vpop.permute.xlu1 %996 }
 0x2be   :  { %v1065_v23 = vadd.f32 %v1042_v12, %v1033_v18  ;;  %v1018_v24 = vadd.f32 %v997_v19, %v978_v21 }
 0x2bf   :  { %v995_v26 = vpop.permute.xlu0 %994 }
 0x2c0   :  { %1073 = vst.msk [vmem:[%s2535_s6 + $0x6] sm:$0xff] %vm946_vm0, %v1065_v23  ;;  %1026 = vst.msk [vmem:[%s2535_s6 + $0x17] sm:$0xff] %vm946_vm0, %v1018_v24  ;;  %v1017_v28 = vadd.f32 %v995_v26, %v977_v27 }
 0x2c1   :  { %v999_v29 = vpop.permute.xlu1 %998 }
 0x2c2   :  { %1025 = vst.msk [vmem:[%s2535_s6 + $0xf] sm:$0xff] %vm946_vm0, %v1017_v28  ;;  %v1019_v8 = vadd.f32 %v999_v29, %v979_v30  ;;  %v983_v28 = vld [vmem:[%s2535_s6 + $0x3f] sm:$0x1] }
 0x2c3   :  { %v1164_v32 = vpop.permute.xlu0 %1163 }
 0x2c4   :  { %1027 = vst.msk [vmem:[%s2535_s6 + $0x1f] sm:$0xff] %vm946_vm0, %v1019_v8 }
 0x2c5   :  { %v1048_v34 = vpop.permute.xlu1 %1047 }
 0x2c7   :  { %v1082_v35 = vld [vmem:[%s2535_s6 + $0x1] sm:$0xff]  ;;  %v1046_v36 = vpop.permute.xlu0 %1045 }
 0x2c8   :  { %v1114_v37 = vadd.f32 %v1091_v14, %v1082_v35 }
 0x2c9   :  { %v1035_v39 = vld [vmem:[%s2535_s6 + $0x16] sm:$0xff]  ;;  %v1097_v40 = vpop.permute.xlu1 %1096  ;;  %v1034_v41 = vld [vmem:[%s2535_s6 + $0xe] sm:$0xff] }
 0x2ca   :  { %1122 = vst.msk [vmem:[%s2535_s6 + $0x1] sm:$0xff] %vm946_vm0, %v1114_v37  ;;  %v1067_v43 = vadd.f32 %v1046_v36, %v1035_v39  ;;  %v1066_v44 = vadd.f32 %v1044_v10, %v1034_v41 }
 0x2cb   :  { %v1036_v45 = vld [vmem:[%s2535_s6 + $0x1e] sm:$0xff]  ;;  %v1095_v49 = vpop.permute.xlu0 %1094 }
 0x2cc   :  { %v1068_v50 = vadd.f32 %v1048_v34, %v1036_v45  ;;  %1075 = vst.msk [vmem:[%s2535_s6 + $0x16] sm:$0xff] %vm946_vm0, %v1067_v43  ;;  %1074 = vst.msk [vmem:[%s2535_s6 + $0xe] sm:$0xff] %vm946_vm0, %v1066_v44 }
 0x2cd   :  { %v1166_v51 = vpop.permute.xlu1 %1165 }
 0x2ce   :  { %1076 = vst.msk [vmem:[%s2535_s6 + $0x1e] sm:$0xff] %vm946_vm0, %v1068_v50 }
 0x2cf   :  { %v1001_v52 = vpop.permute.xlu0 %1000 }
 0x2d0   :  { %v1020_v57 = vadd.f32 %v1001_v52, %v980_v56 }
 0x2d1   :  { %v1131_v59 = vld [vmem:[%s2535_s6] sm:$0xff]  ;;  %v1003_v61 = vpop.permute.xlu1 %1002 }
 0x2d2   :  { %v1187_v54 = vadd.f32 %v1164_v32, %v1131_v59  ;;  %1028 = vst.msk [vmem:[%s2535_s6 + $0x27] sm:$0xff] %vm946_vm0, %v1020_v57  ;;  %v1021_v0 = vadd.f32 %v1003_v61, %v981_v63 }
 0x2d3   :  { %v1084_v1 = vld [vmem:[%s2535_s6 + $0x11] sm:$0xff]  ;;  %v1083_v2 = vld [vmem:[%s2535_s6 + $0x9] sm:$0xff]  ;;  %v1050_v3 = vpop.permute.xlu0 %1049 }
 0x2d4   :  { %1195 = vst.msk [vmem:[%s2535_s6] sm:$0xff] %vm946_vm0, %v1187_v54  ;;  %v1116_v4 = vadd.f32 %v1095_v49, %v1084_v1  ;;  %v1115_v6 = vadd.f32 %v1093_v38, %v1083_v2  ;;  %1029 = vst.msk [vmem:[%s2535_s6 + $0x2f] sm:$0xff] %vm946_vm0, %v1021_v0 }
 0x2d5   :  { %v1085_v7 = vld [vmem:[%s2535_s6 + $0x19] sm:$0xff]  ;;  %v1052_v9 = vpop.permute.xlu1 %1051 }
 0x2d6   :  { %v1117_v11 = vadd.f32 %v1097_v40, %v1085_v7  ;;  %1124 = vst.msk [vmem:[%s2535_s6 + $0x11] sm:$0xff] %vm946_vm0, %v1116_v4  ;;  %1123 = vst.msk [vmem:[%s2535_s6 + $0x9] sm:$0xff] %vm946_vm0, %v1115_v6 }
 0x2d7   :  { %v1099_v20 = vpop.permute.xlu0 %1098 }
 0x2d8   :  { %1125 = vst.msk [vmem:[%s2535_s6 + $0x19] sm:$0xff] %vm946_vm0, %v1117_v11 }
 0x2d9   :  { %v1037_v22 = vld [vmem:[%s2535_s6 + $0x26] sm:$0xff]  ;;  %v1101_v13 = vpop.permute.xlu1 %1100 }
 0x2da   :  { %v1069_v42 = vadd.f32 %v1050_v3, %v1037_v22 }
 0x2db   :  { %v1038_v58 = vld [vmem:[%s2535_s6 + $0x2e] sm:$0xff]  ;;  %v1005_v62 = vpop.permute.xlu0 %1004  ;;  %v1203_v41 = vld [vmem:[%s2535_s6] sm:$0xff] }
 0x2dc   :  { %1077 = vst.msk [vmem:[%s2535_s6 + $0x26] sm:$0xff] %vm946_vm0, %v1069_v42  ;;  %v1070_v15 = vadd.f32 %v1052_v9, %v1038_v58  ;;  %v1022_v17 = vadd.f32 %v1005_v62, %v982_v16 }
 0x2dd   :  { %v1132_v46 = vld [vmem:[%s2535_s6 + $0x8] sm:$0xff]  ;;  %v1170_v47 = vpop.permute.xlu1 %1169  ;;  %v1133_v12 = vld [vmem:[%s2535_s6 + $0x10] sm:$0xff] }
 0x2de   :  { %v1188_v5 = vadd.f32 %v1166_v51, %v1132_v46  ;;  %1078 = vst.msk [vmem:[%s2535_s6 + $0x2e] sm:$0xff] %vm946_vm0, %v1070_v15  ;;  %1030 = vst.msk [vmem:[%s2535_s6 + $0x37] sm:$0xff] %vm946_vm0, %v1022_v17 }
 0x2df   :  { %v1134_v10 = vld [vmem:[%s2535_s6 + $0x18] sm:$0xff]  ;;  %v1168_v38 = vpop.permute.xlu0 %1167 }
 0x2e0   :  { %1196 = vst.msk [vmem:[%s2535_s6 + $0x8] sm:$0xff] %vm946_vm0, %v1188_v5  ;;  %v1190_v14 = vadd.f32 %v1170_v47, %v1134_v10  ;;  %v1189_v18 = vadd.f32 %v1168_v38, %v1133_v12  ;;  %v904_v38 = vld [vmem:[#allocation4 + $0x28] sm:$0xff] }
 0x2e1   :  { %v1230_v19 = vpop.permute.xlu1 %1229 }
 0x2e2   :  { %1198 = vst.msk [vmem:[%s2535_s6 + $0x18] sm:$0xff] %vm946_vm0, %v1190_v14  ;;  %1197 = vst.msk [vmem:[%s2535_s6 + $0x10] sm:$0xff] %vm946_vm0, %v1189_v18 }
 0x2e3   :  { %v1086_v21 = vld [vmem:[%s2535_s6 + $0x21] sm:$0xff]  ;;  %v1172_v23 = vpop.permute.xlu0 %1171 }
 0x2e4   :  { %v1118_v24 = vadd.f32 %v1099_v20, %v1086_v21 }
 0x2e5   :  { %v1087_v26 = vld [vmem:[%s2535_s6 + $0x29] sm:$0xff]  ;;  %v1007_v27 = vpop.permute.xlu1 %1006  ;;  %v1039_v34 = vld [vmem:[%s2535_s6 + $0x36] sm:$0xff] }
 0x2e6   :  { %1126 = vst.msk [vmem:[%s2535_s6 + $0x21] sm:$0xff] %vm946_vm0, %v1118_v24  ;;  %v1119_v29 = vadd.f32 %v1101_v13, %v1087_v26  ;;  %v1023_v30 = vadd.f32 %v1007_v27, %v983_v28  ;;  %v927_v27 = vmul.f32 %v904_v38, %v1936_v33 }
 0x2e7   :  { %v1204_v8 = vld [vmem:[%s2535_s6 + $0x8] sm:$0xff]  ;;  %v1054_v32 = vpop.permute.xlu0 %1053 }
 0x2e8   :  { %1127 = vst.msk [vmem:[%s2535_s6 + $0x29] sm:$0xff] %vm946_vm0, %v1119_v29  ;;  %v1252_v35 = vadd.f32 %v1230_v19, %v1204_v8  ;;  %v1071_v36 = vadd.f32 %v1054_v32, %v1039_v34  ;;  %v907_v34 = vld [vmem:[#allocation4 + $0x40] sm:$0xff] }
 0x2e9   :  { %1032 = vst.msk [vmem:[%s2535_s6 + $0x3f] sm:$0x1] %vm1031_vm4, %v1023_v30  ;;  %v1206_v37 = vld [vmem:[%s2535_s6 + $0x18] sm:$0xff]  ;;  %v1234_v39 = vpop.permute.xlu1 %1233  ;;  %v1205_v63 = vld [vmem:[%s2535_s6 + $0x10] sm:$0xff] }
 0x2ea   :  { %1260 = vst.msk [vmem:[%s2535_s6 + $0x8] sm:$0xff] %vm946_vm0, %v1252_v35  ;;  %1079 = vst.msk [vmem:[%s2535_s6 + $0x36] sm:$0xff] %vm946_vm0, %v1071_v36  ;;  %v1254_v40 = vadd.f32 %v1234_v39, %v1206_v37  ;;  %v910_v39 = vld [vmem:[#allocation4 + $0x58] sm:$0xff] }
 0x2eb   :  { %v1228_v43 = vpop.permute.xlu0 %1227 }
 0x2ec   :  { %1262 = vst.msk [vmem:[%s2535_s6 + $0x18] sm:$0xff] %vm946_vm0, %v1254_v40  ;;  %v1251_v44 = vadd.f32 %v1228_v43, %v1203_v41 }
 0x2ed   :  { %v1135_v45 = vld [vmem:[%s2535_s6 + $0x20] sm:$0xff]  ;;  %v1056_v49 = vpop.permute.xlu1 %1055 }
 0x2ee   :  { %v1191_v50 = vadd.f32 %v1172_v23, %v1135_v45  ;;  %1259 = vst.msk [vmem:[%s2535_s6] sm:$0xff] %vm946_vm0, %v1251_v44  ;;  %v930_v44 = vmul.f32 %v1925_v25, %v907_v34 }
 0x2ef   :  { %v1103_v52 = vpop.permute.xlu0 %1102  ;;  %v1136_v1 = vld [vmem:[%s2535_s6 + $0x28] sm:$0xff] }
 0x2f0   :  { %v1040_v51 = vld [vmem:[%s2535_s6 + $0x3e] sm:$0x3]  ;;  %1199 = vst.msk [vmem:[%s2535_s6 + $0x20] sm:$0xff] %vm946_vm0, %v1191_v50  ;;  %v913_v50 = vld [vmem:[#allocation4 + $0x70] sm:$0xff] }
 0x2f1   :  { %v1072_v56 = vadd.f32 %v1056_v49, %v1040_v51  ;;  %v1088_v57 = vld [vmem:[%s2535_s6 + $0x31] sm:$0xff]  ;;  %v1105_v59 = vpop.permute.xlu1 %1104  ;;  %v1268_v18 = vld [vmem:[%s2535_s6 + $0x8] sm:$0xff] }
 0x2f2   :  { %v1120_v61 = vadd.f32 %v1103_v52, %v1088_v57  ;;  %v933_v57 = vmul.f32 %v1929_v31, %v910_v39 }
 0x2f3   :  { %1081 = vst.msk [vmem:[%s2535_s6 + $0x3e] sm:$0x3] %vm1080_vm5, %v1072_v56  ;;  %v1232_v54 = vpop.permute.xlu0 %1231  ;;  %v1270_v30 = vld [vmem:[%s2535_s6 + $0x18] sm:$0xff] }
 0x2f4   :  { %1128 = vst.msk [vmem:[%s2535_s6 + $0x31] sm:$0xff] %vm946_vm0, %v1120_v61  ;;  %v1253_v0 = vadd.f32 %v1232_v54, %v1205_v63  ;;  %v916_v61 = vld [vmem:[#allocation4 + $0x88] sm:$0xff]  ;;  %v936_v54 = vmul.f32 %v913_v50, %v1956_v53 }
 0x2f5   :  { %v1174_v2 = vpop.permute.xlu1 %1173  ;;  %v1267_v16 = vld [vmem:[%s2535_s6] sm:$0xff] }
 0x2f6   :  { %1261 = vst.msk [vmem:[%s2535_s6 + $0x10] sm:$0xff] %vm946_vm0, %v1253_v0  ;;  %v1192_v3 = vadd.f32 %v1174_v2, %v1136_v1  ;;  %v919_v0 = vld [vmem:[#allocation4 + $0xa0] sm:$0xff]  ;;  %v939_v2 = vmul.f32 %v916_v61, %v1967_v60 }
 0x2f7   :  { %v1207_v4 = vld [vmem:[%s2535_s6 + $0x20] sm:$0xff]  ;;  %v1236_v6 = vpop.permute.xlu0 %1235 }
 0x2f8   :  { %1200 = vst.msk [vmem:[%s2535_s6 + $0x28] sm:$0xff] %vm946_vm0, %v1192_v3  ;;  %v1255_v7 = vadd.f32 %v1236_v6, %v1207_v4  ;;  %v922_v3 = vld [vmem:[#allocation4 + $0xb8] sm:$0xff]  ;;  %v942_v6 = vmul.f32 %v1952_v48, %v919_v0 }
 0x2f9   :  { %v1238_v11 = vpop.permute.xlu1 %1237 }
 0x2fa   :  { %v1089_v9 = vld [vmem:[%s2535_s6 + $0x39] sm:$0x7f]  ;;  %1263 = vst.msk [vmem:[%s2535_s6 + $0x20] sm:$0xff] %vm946_vm0, %v1255_v7 }
 0x2fb   :  { %v1121_v20 = vadd.f32 %v1105_v59, %v1089_v9  ;;  %v1176_v22 = vpop.permute.xlu0 %1175  ;;  %v1137_v13 = vld [vmem:[%s2535_s6 + $0x30] sm:$0xff] }
 0x2fc   :  { %v1193_v42 = vadd.f32 %v1176_v22, %v1137_v13 }
 0x2fd   :  { %1130 = vst.msk [vmem:[%s2535_s6 + $0x39] sm:$0x7f] %vm1129_vm6, %v1121_v20  ;;  %v1178_v58 = vpop.permute.xlu1 %1177  ;;  %v1269_v24 = vld [vmem:[%s2535_s6 + $0x10] sm:$0xff]  ;;  %v945_v20 = vmul.f32 %v1960_v55, %v922_v3 }
 0x2fe   :  { %1201 = vst.msk [vmem:[%s2535_s6 + $0x30] sm:$0xff] %vm946_vm0, %v1193_v42 }
 0x2ff   :  { %v1208_v62 = vld [vmem:[%s2535_s6 + $0x28] sm:$0xff]  ;;  %v1292_v15 = vpop.permute.xlu0 %1291 }
 0x300   :  { %v1256_v17 = vadd.f32 %v1238_v11, %v1208_v62  ;;  %v1315_v46 = vadd.f32 %v1292_v15, %v1267_v16 }
 0x301   :  { %v1242_v47 = vpop.permute.xlu1 %1241  ;;  %v1271_v35 = vld [vmem:[%s2535_s6 + $0x20] sm:$0xff] }
 0x302   :  { %1264 = vst.msk [vmem:[%s2535_s6 + $0x28] sm:$0xff] %vm946_vm0, %v1256_v17  ;;  %1323 = vst.msk [vmem:[%s2535_s6] sm:$0xff] %vm946_vm0, %v1315_v46 }
 0x303   :  { %v1240_v10 = vpop.permute.xlu0 %1239 }
 0x304   :  { %v1138_v5 = vld [vmem:[%s2535_s6 + $0x38] sm:$0x7f] }
 0x305   :  { %v1194_v12 = vadd.f32 %v1178_v58, %v1138_v5  ;;  %v1209_v14 = vld [vmem:[%s2535_s6 + $0x30] sm:$0xff]  ;;  %v1294_v19 = vpop.permute.xlu1 %1293 }
 0x306   :  { %v1257_v21 = vadd.f32 %v1240_v10, %v1209_v14  ;;  %v1316_v23 = vadd.f32 %v1294_v19, %v1268_v18 }
 0x307   :  { %1202 = vst.msk [vmem:[%s2535_s6 + $0x38] sm:$0x7f] %vm1129_vm6, %v1194_v12  ;;  %v1296_v26 = vpop.permute.xlu0 %1295 }
 0x308   :  { %1265 = vst.msk [vmem:[%s2535_s6 + $0x30] sm:$0xff] %vm946_vm0, %v1257_v21  ;;  %1324 = vst.msk [vmem:[%s2535_s6 + $0x8] sm:$0xff] %vm946_vm0, %v1316_v23  ;;  %v1317_v28 = vadd.f32 %v1296_v26, %v1269_v24 }
 0x309   :  { %v1331_v29 = vld [vmem:[%s2535_s6] sm:$0xff]  ;;  %v1298_v33 = vpop.permute.xlu1 %1297  ;;  %v1272_v41 = vld [vmem:[%s2535_s6 + $0x28] sm:$0xff] }
 0x30a   :  { %v1338_v8 = vadd.f32 %v1331_v29, %v927_v27  ;;  %1325 = vst.msk [vmem:[%s2535_s6 + $0x10] sm:$0xff] %vm946_vm0, %v1317_v28  ;;  %v1318_v32 = vadd.f32 %v1298_v33, %v1270_v30 }
 0x30b   :  { %v1300_v36 = vpop.permute.xlu0 %1299 }
 0x30c   :  { %1345 = vst.msk [vmem:[%s2535_s6] sm:$0xff] %vm946_vm0, %v1338_v8  ;;  %1326 = vst.msk [vmem:[%s2535_s6 + $0x18] sm:$0xff] %vm946_vm0, %v1318_v32  ;;  %v1319_v37 = vadd.f32 %v1300_v36, %v1271_v35 }
 0x30d   :  { %v1302_v43 = vpop.permute.xlu1 %1301 }
 0x30e   :  { %v1210_v40 = vld [vmem:[%s2535_s6 + $0x38] sm:$0x3]  ;;  %1327 = vst.msk [vmem:[%s2535_s6 + $0x20] sm:$0xff] %vm946_vm0, %v1319_v37  ;;  %v1320_v49 = vadd.f32 %v1302_v43, %v1272_v41 }
 0x30f   :  { %v1258_v45 = vadd.f32 %v1242_v47, %v1210_v40  ;;  %v1332_v51 = vld [vmem:[%s2535_s6 + $0x8] sm:$0xff]  ;;  %v1304_v52 = vpop.permute.xlu0 %1303  ;;  %v1273_v56 = vld [vmem:[%s2535_s6 + $0x30] sm:$0xff] }
 0x310   :  { %v1339_v25 = vadd.f32 %v1332_v51, %v930_v44  ;;  %1328 = vst.msk [vmem:[%s2535_s6 + $0x28] sm:$0xff] %vm946_vm0, %v1320_v49  ;;  %v1321_v59 = vadd.f32 %v1304_v52, %v1273_v56 }
 0x311   :  { %1266 = vst.msk [vmem:[%s2535_s6 + $0x38] sm:$0x3] %vm1080_vm5, %v1258_v45  ;;  %v1333_v63 = vld [vmem:[%s2535_s6 + $0x10] sm:$0xff]  ;;  %v1306_v9 = vpop.permute.xlu1 %1305 }
 0x312   :  { %1346 = vst.msk [vmem:[%s2535_s6 + $0x8] sm:$0xff] %vm946_vm0, %v1339_v25  ;;  %v1340_v31 = vadd.f32 %v1333_v63, %v933_v57  ;;  %1329 = vst.msk [vmem:[%s2535_s6 + $0x30] sm:$0xff] %vm946_vm0, %v1321_v59 }
 0x313   :  { %v1334_v1 = vld [vmem:[%s2535_s6 + $0x18] sm:$0xff] }
 0x314   :  { %1347 = vst.msk [vmem:[%s2535_s6 + $0x10] sm:$0xff] %vm946_vm0, %v1340_v31  ;;  %v1341_v53 = vadd.f32 %v1334_v1, %v936_v54 }
 0x315   :  { %v1335_v4 = vld [vmem:[%s2535_s6 + $0x20] sm:$0xff] }
 0x316   :  { %1348 = vst.msk [vmem:[%s2535_s6 + $0x18] sm:$0xff] %vm946_vm0, %v1341_v53  ;;  %v1342_v7 = vadd.f32 %v1335_v4, %v939_v2 }
 0x317   :  { %v1336_v60 = vld [vmem:[%s2535_s6 + $0x28] sm:$0xff] }
 0x318   :  { %v1274_v11 = vld [vmem:[%s2535_s6 + $0x38] sm:$0x1]  ;;  %1349 = vst.msk [vmem:[%s2535_s6 + $0x20] sm:$0xff] %vm946_vm0, %v1342_v7  ;;  %v1343_v48 = vadd.f32 %v1336_v60, %v942_v6 }
 0x319   :  { %v1322_v22 = vadd.f32 %v1306_v9, %v1274_v11  ;;  %v1337_v13 = vld [vmem:[%s2535_s6 + $0x30] sm:$0xff] }
 0x31a   :  { %1350 = vst.msk [vmem:[%s2535_s6 + $0x28] sm:$0xff] %vm946_vm0, %v1343_v48  ;;  %v1344_v42 = vadd.f32 %v1337_v13, %v945_v20 }
 0x31b   :  { %1330 = vst.msk [vmem:[%s2535_s6 + $0x38] sm:$0x1] %vm1031_vm4, %v1322_v22 }
 0x31c   :  { %1351 = vst.msk [vmem:[%s2535_s6 + $0x30] sm:$0xff] %vm946_vm0, %v1344_v42 }
 0x31d   :  { %1356 = vsyncpa [#allocation3], 1 }
 0x31e   :  { %1357 = vsyncpa [#allocation5], 1 }

</bundles_post_ra>
